<compile_context>
chip_gen: v5e
topology: v5e:2x2
jax: 0.10.0
libtpu: 0.0.40
codegen_flags: <defaults>
</compile_context>

<pallas_src>
import functools

import numpy as np
import jax
import jax.numpy as jnp
from jax import lax
from jax.experimental import pallas as pl
from jax.experimental.pallas import tpu as pltpu


def _round_up(v, m):
    return (v + m - 1) // m * m


def _vmem_limit_bytes():
    """~3/4 of physical VMEM (96 MiB on v5e/v6e, 48 MiB on v7x), 32 MiB fallback."""
    try:
        cap = getattr(pltpu.get_tpu_info(), "vmem_capacity_bytes", None)
    except Exception:
        cap = None
    if not cap:
        return 32 * 1024 * 1024
    return int(min(cap * 3 // 4, 100 * 1024 * 1024))


# ---------------------------------------------------------------------------
# Tiled projection matmul kernels (P1 + P3 accumulator pattern)
# ---------------------------------------------------------------------------

def _matmul_kernel(x_ref, w_ref, o_ref, acc_ref, *, compute_dtype):
    @pl.when(pl.program_id(2) == 0)
    def _init():
        acc_ref[...] = jnp.zeros_like(acc_ref)

    xb = x_ref[...]
    wb = w_ref[...]
    if compute_dtype is not None:
        xb = xb.astype(compute_dtype)
        wb = wb.astype(compute_dtype)
    acc_ref[...] += jnp.dot(xb, wb, preferred_element_type=jnp.float32)

    @pl.when(pl.program_id(2) == pl.num_programs(2) - 1)
    def _store():
        o_ref[...] = acc_ref[...].astype(o_ref.dtype)


def _matmul_bias_kernel(x_ref, w_ref, b_ref, o_ref, acc_ref, *, compute_dtype):
    @pl.when(pl.program_id(2) == 0)
    def _init():
        acc_ref[...] = jnp.zeros_like(acc_ref)

    xb = x_ref[...]
    wb = w_ref[...]
    if compute_dtype is not None:
        xb = xb.astype(compute_dtype)
        wb = wb.astype(compute_dtype)
    acc_ref[...] += jnp.dot(xb, wb, preferred_element_type=jnp.float32)

    @pl.when(pl.program_id(2) == pl.num_programs(2) - 1)
    def _store():
        o_ref[...] = (acc_ref[...] + b_ref[...]).astype(o_ref.dtype)


def _pallas_matmul(x, w, bias=None, *, out_dtype=None, compute_dtype=None,
                   tm=1024, tn=512, tk=512):
    """Tiled y = x @ w (+ bias).

    M and N use ragged boundary blocks (no padding copies; Pallas masks the
    boundary writeback); only the K reduction axis is zero-padded when needed.
    """
    M, K = x.shape
    _, N = w.shape
    if out_dtype is None:
        out_dtype = x.dtype

    # Full-extent blocks when the dim is small (no (8,128) constraint then),
    # otherwise hardware-aligned tiles.
    tm = M if M <= tm else tm
    tn = N if N <= tn else tn
    tk = K if K <= tk else tk
    if K % tk != 0:   # garbage in the reduction axis would corrupt the result
        Kp = _round_up(K, tk)
        x = jnp.pad(x, ((0, 0), (0, Kp - K)))
        w = jnp.pad(w, ((0, Kp - K), (0, 0)))
        K = Kp

    grid = (pl.cdiv(M, tm), pl.cdiv(N, tn), K // tk)   # reduction axis last
    x_spec = pl.BlockSpec((tm, tk), lambda i, j, k: (i, k))
    w_spec = pl.BlockSpec((tk, tn), lambda i, j, k: (k, j))
    o_spec = pl.BlockSpec((tm, tn), lambda i, j, k: (i, j))
    params = pltpu.CompilerParams(
        dimension_semantics=("parallel", "parallel", "arbitrary"),
        vmem_limit_bytes=_vmem_limit_bytes())
    scratch = [pltpu.VMEM((tm, tn), jnp.float32)]

    bytes_accessed = (M * K * x.dtype.itemsize + K * N * w.dtype.itemsize
                      + M * N * np.dtype(out_dtype).itemsize)
    if bias is not None:
        bytes_accessed += bias.size * bias.dtype.itemsize
    cost = pl.CostEstimate(flops=2 * M * N * K, transcendentals=0,
                           bytes_accessed=int(bytes_accessed))
    out_shape = jax.ShapeDtypeStruct((M, N), out_dtype)

    if bias is None:
        kernel = functools.partial(_matmul_kernel, compute_dtype=compute_dtype)
        return pl.pallas_call(
            kernel, out_shape=out_shape, grid=grid,
            in_specs=[x_spec, w_spec], out_specs=o_spec,
            scratch_shapes=scratch, compiler_params=params,
            cost_estimate=cost,
        )(x, w)

    kernel = functools.partial(_matmul_bias_kernel, compute_dtype=compute_dtype)
    b_spec = pl.BlockSpec((1, tn), lambda i, j, k: (0, j))
    return pl.pallas_call(
        kernel, out_shape=out_shape, grid=grid,
        in_specs=[x_spec, w_spec, b_spec], out_specs=o_spec,
        scratch_shapes=scratch, compiler_params=params,
        cost_estimate=cost,
    )(x, w, bias)


# ---------------------------------------------------------------------------
# Fused text + axial-image attention kernel
#   inputs : q/k/v column blocks of the raw qkv projection, (1, n_pad, gh*D)
#   output : (1, n_pad, gh*D)  -- lane-dense, group heads merged on the lane axis
# ---------------------------------------------------------------------------

def _grid_transpose(t):
    """(G, A, B, D) -> (G, B, A, D) using static slices + leading-dim concat
    (avoids lax.transpose permutations that move a tiled dim)."""
    num_b = t.shape[2]
    parts = [t[:, :, i, :][:, None, :, :] for i in range(num_b)]
    return jnp.concatenate(parts, axis=1)


def _merge_heads_lanes(t):
    """(G, R, D) -> (R, G*D): merge heads onto the lane axis in registers."""
    gh = t.shape[0]
    if gh == 1:
        return t[0]
    return jnp.concatenate([t[h] for h in range(gh)], axis=-1)


def _fused_attn_kernel(q_ref, k_ref, v_ref, o_ref, *, text_len, image_size,
                       axis, scale, group_heads):
    n_pad = q_ref.shape[1]
    gh = group_heads
    D = q_ref.shape[2] // gh
    X = image_size
    img_len = X * X
    neg = jnp.float32(-jnp.finfo(jnp.float32).max)

    def split_heads(ref):
        blk = ref[0]                                     # (n_pad, gh*D)
        if gh == 1:
            return blk[None]
        parts = [blk[:, h * D:(h + 1) * D][None] for h in range(gh)]
        return jnp.concatenate(parts, axis=0)            # (gh, n_pad, D)

    q = split_heads(q_ref) * scale     # scale fused in-kernel
    k = split_heads(k_ref)
    v = split_heads(v_ref)

    qt, qi = q[:, :text_len, :], q[:, text_len:, :]
    kt, ki = k[:, :text_len, :], k[:, text_len:, :]
    vt, vi = v[:, :text_len, :], v[:, text_len:, :]

    # ---- text -> text causal attention, batched over the head group --------
    s_t = lax.dot_general(qt, kt, (((2,), (2,)), ((0,), (0,))),
                          preferred_element_type=jnp.float32)        # (gh, T, T)
    row = lax.broadcasted_iota(jnp.int32, (text_len, text_len), 0)
    col = lax.broadcasted_iota(jnp.int32, (text_len, text_len), 1)
    s_t = jnp.where((col > row)[None], neg, s_t)
    m_t = jnp.max(s_t, axis=-1, keepdims=True)
    e_t = jnp.exp(s_t - m_t)
    inv_t = pl.reciprocal(jnp.sum(e_t, axis=-1, keepdims=True), approx=True)
    # reciprocal folded into the OUTPUT (no probability matrix materialized)
    out_t = lax.dot_general(e_t.astype(vt.dtype), vt,
                            (((2,), (1,)), ((0,), (0,))),
                            preferred_element_type=jnp.float32) * inv_t  # (gh,T,D)

    # ---- axial image attention (image->image causal + image->text) ---------
    def axial_split(t):
        t4 = t.reshape(gh, X, X, D)        # (gh, h, w, D)
        if axis == 1:                      # attend along width -> (gh, w, h, D)
            t4 = _grid_transpose(t4)
        return t4.reshape(gh * X, X, D)    # (gh*slices, seq, D)

    qi4, ki4, vi4 = axial_split(qi), axial_split(ki), axial_split(vi)
    qi3 = qi4.reshape(gh, img_len, D)

    d_ii = lax.dot_general(qi4, ki4, (((2,), (2,)), ((0,), (0,))),
                           preferred_element_type=jnp.float32)       # (gh*X, I, I)
    d_it = lax.dot_general(qi3, kt, (((2,), (2,)), ((0,), (0,))),
                           preferred_element_type=jnp.float32)       # (gh, XI, T)
    d_it = d_it.reshape(gh * X, X, text_len)

    rowi = lax.broadcasted_iota(jnp.int32, (X, X), 0)
    coli = lax.broadcasted_iota(jnp.int32, (X, X), 1)
    d_ii = jnp.where((coli > rowi)[None], neg, d_ii)   # text keys never masked

    m_i = jnp.maximum(jnp.max(d_ii, axis=-1, keepdims=True),
                      jnp.max(d_it, axis=-1, keepdims=True))
    e_ii = jnp.exp(d_ii - m_i)
    e_it = jnp.exp(d_it - m_i)
    inv_i = pl.reciprocal(jnp.sum(e_ii, axis=-1, keepdims=True)
                          + jnp.sum(e_it, axis=-1, keepdims=True), approx=True)

    o_ii = lax.dot_general(e_ii.astype(vi4.dtype), vi4,
                           (((2,), (1,)), ((0,), (0,))),
                           preferred_element_type=jnp.float32)       # (gh*X, I, D)
    o_it = lax.dot_general(e_it.reshape(gh, img_len, text_len).astype(vt.dtype),
                           vt, (((2,), (1,)), ((0,), (0,))),
                           preferred_element_type=jnp.float32)       # (gh, XI, D)
    out_i = (o_ii + o_it.reshape(gh * X, X, D)) * inv_i              # (gh*X, I, D)

    out_i = out_i.reshape(gh, X, X, D)
    if axis == 1:                         # back to row-major (h, w) token order
        out_i = _grid_transpose(out_i)
    out_i = out_i.reshape(gh, img_len, D)

    # ---- lane-dense epilogue: heads merged in registers, full-width stores --
    o_ref[0, :text_len, :] = _merge_heads_lanes(out_t).astype(o_ref.dtype)
    o_ref[0, text_len:, :] = _merge_heads_lanes(out_i).astype(o_ref.dtype)


def _pallas_fused_attention(qkv, *, heads, dim_head, text_len, image_size,
                            axis, scale, out_dtype):
    b, n_pad, three_inner = qkv.shape
    inner = heads * dim_head
    assert three_inner == 3 * inner

    # Head-group size: smallest divisor of `heads` with a 128-aligned lane
    # width -> lane-dense blocks, bounded VMEM per step, extra parallel grid
    # axis (megacore on v7x).
    group_heads = None
    for cand in range(1, heads + 1):
        if heads % cand == 0 and (cand * dim_head) % 128 == 0:
            group_heads = cand
            break

    if group_heads is not None:
        n_groups = heads // group_heads
        blk = (1, n_pad, group_heads * dim_head)
        # Read q/k/v as disjoint column blocks of the raw qkv projection output
        # (no wrapper-side transpose / HBM repack between the two Pallas calls).
        in_specs = [
            pl.BlockSpec(blk, lambda bi, gi: (bi, 0, gi)),
            pl.BlockSpec(blk, lambda bi, gi, ng=n_groups: (bi, 0, ng + gi)),
            pl.BlockSpec(blk, lambda bi, gi, ng=n_groups: (bi, 0, 2 * ng + gi)),
        ]
        out_spec = pl.BlockSpec(blk, lambda bi, gi: (bi, 0, gi))
        operands = (qkv, qkv, qkv)
    else:
        # Lane width not 128-alignable (tiny head dims): single group holding
        # all heads, q/k/v split in the wrapper.
        group_heads = heads
        n_groups = 1
        blk = (1, n_pad, inner)
        spec = pl.BlockSpec(blk, lambda bi, gi: (bi, 0, 0))
        in_specs = [spec, spec, spec]
        out_spec = pl.BlockSpec(blk, lambda bi, gi: (bi, 0, 0))
        operands = (qkv[..., :inner], qkv[..., inner:2 * inner],
                    qkv[..., 2 * inner:])

    T, X, D = text_len, image_size, dim_head
    img_len = X * X
    cost = pl.CostEstimate(
        flops=int(4 * b * heads * D * (T * T + X ** 3 + img_len * T)),
        transcendentals=int(b * heads * (T * T + img_len * (X + T))),
        bytes_accessed=int(qkv.size * qkv.dtype.itemsize
                           + b * n_pad * inner * np.dtype(out_dtype).itemsize))

    kernel = functools.partial(
        _fused_attn_kernel, text_len=text_len, image_size=image_size,
        axis=axis, scale=scale, group_heads=group_heads)

    return pl.pallas_call(
        kernel,
        out_shape=jax.ShapeDtypeStruct((b, n_pad, inner), out_dtype),
        grid=(b, n_groups),
        in_specs=in_specs,
        out_specs=out_spec,
        compiler_params=pltpu.CompilerParams(
            dimension_semantics=("parallel", "parallel"),
            vmem_limit_bytes=_vmem_limit_bytes()),
        cost_estimate=cost,
    )(*operands)


# ---------------------------------------------------------------------------
# Full module forward (thin glue in JAX, hot paths in Pallas)
# ---------------------------------------------------------------------------

def sparse_axial_causal_attention(x, params, *, seq_len, image_size, axis,
                                  heads, dim_head):
    b, n, dim = x.shape
    img_seq_len = image_size ** 2
    text_len = seq_len + 1 - img_seq_len
    padding = seq_len - n + 1
    n_pad = seq_len + 1
    inner = heads * dim_head
    scale = dim_head ** -0.5

    xp = jnp.pad(x, ((0, 0), (0, padding), (0, 0)))

    # qkv projection: tiled Pallas matmul, bf16 MXU compute, bf16 output
    # (halves HBM traffic into the attention kernel).
    qkv = _pallas_matmul(xp.reshape(b * n_pad, dim), params['w_qkv'],
                         out_dtype=jnp.bfloat16, compute_dtype=jnp.bfloat16)
    qkv = qkv.reshape(b, n_pad, 3 * inner)      # free reshape, no transpose

    # fused text + axial-image attention; axis handled inside the kernel.
    out = _pallas_fused_attention(
        qkv, heads=heads, dim_head=dim_head, text_len=text_len,
        image_size=image_size, axis=axis, scale=scale,
        out_dtype=jnp.bfloat16)                 # (b, n_pad, inner)

    # output projection + bias (bf16 operands, f32 accumulate / output)
    out = _pallas_matmul(out.reshape(b * n_pad, inner),
                         params['w_out'].astype(jnp.bfloat16),
                         params['b_out'], out_dtype=x.dtype)
    return out.reshape(b, n_pad, dim)[:, :n]


# ---------------------------------------------------------------------------
# Pure-JAX reference (mirrors the PyTorch forward exactly) for verification
# ---------------------------------------------------------------------------

def reference_forward(x, params, *, seq_len, image_size, axis, heads, dim_head):
    b, n, dim = x.shape
    img_seq_len = image_size ** 2
    text_len = seq_len + 1 - img_seq_len
    padding = seq_len - n + 1
    n_pad = seq_len + 1
    inner = heads * dim_head
    neg = -jnp.finfo(jnp.float32).max

    xp = jnp.pad(x, ((0, 0), (0, padding), (0, 0)))
    qkv = xp @ params['w_qkv']
    q, k, v = jnp.split(qkv, 3, axis=-1)

    def sh(t):
        return t.reshape(b, n_pad, heads, dim_head) \
                .transpose(0, 2, 1, 3).reshape(b * heads, n_pad, dim_head)

    q, k, v = sh(q), sh(k), sh(v)
    q = q * (dim_head ** -0.5)

    qt, qi = q[:, :text_len], q[:, text_len:]
    kt, ki = k[:, :text_len], k[:, text_len:]
    vt, vi = v[:, :text_len], v[:, text_len:]

    dots_text = jnp.einsum('bid,bjd->bij', qt, kt)
    cmask = jnp.triu(jnp.ones((text_len, text_len), bool), 1)
    dots_text = jnp.where(cmask, neg, dots_text)
    attn_text = jax.nn.softmax(dots_text, axis=-1)
    out_text = jnp.einsum('bij,bjd->bid', attn_text, vt)

    def split_axis(t):
        t = t.reshape(b * heads, image_size, image_size, dim_head)
        if axis == 1:
            t = t.transpose(0, 2, 1, 3)
        return t

    qi4, ki4, vi4 = map(split_axis, (qi, ki, vi))
    d_ii = jnp.einsum('bxid,bxjd->bxij', qi4, ki4)
    d_it = jnp.einsum('bxid,bjd->bxij', qi4, kt)
    dots = jnp.concatenate([d_it, d_ii], axis=-1)
    causal = jnp.triu(jnp.ones((image_size, image_size), bool), 1)
    full_mask = jnp.concatenate(
        [jnp.zeros((image_size, text_len), bool), causal], axis=-1)
    dots = jnp.where(full_mask[None, None], neg, dots)
    attn = jax.nn.softmax(dots, axis=-1)
    a_it, a_ii = attn[..., :text_len], attn[..., text_len:]
    out_img = jnp.einsum('bxij,bxjd->bxid', a_ii, vi4) + \
              jnp.einsum('bxij,bjd->bxid', a_it, vt)
    if axis == 0:
        out_img = out_img.reshape(b * heads, img_seq_len, dim_head)
    else:
        out_img = out_img.transpose(0, 2, 1, 3) \
                         .reshape(b * heads, img_seq_len, dim_head)

    out = jnp.concatenate([out_text, out_img], axis=1)
    out = out.reshape(b, heads, n_pad, dim_head) \
             .transpose(0, 2, 1, 3).reshape(b, n_pad, inner)
    out = out @ params['w_out'] + params['b_out']
    return out[:, :n]


# ---------------------------------------------------------------------------
# Main
# ---------------------------------------------------------------------------

if __name__ == "__main__":
    key = jax.random.PRNGKey(0)

    b, n, dim = 2, 20, 32
    image_size = 4
    text_len_cfg = 8
    img_seq_len = image_size ** 2
    seq_len = text_len_cfg + img_seq_len - 1        # 23 -> padded seq = 24

    configs = [
        dict(heads=4, dim_head=64),   # lane-aligned multi-group path
        dict(heads=2, dim_head=16),   # tiny-head fallback (single group)
    ]

    max_err_seen = 0.0
    for cfg in configs:
        heads, dim_head = cfg['heads'], cfg['dim_head']
        inner = heads * dim_head
        k_x, k_qkv, k_out, k_b, key = jax.random.split(key, 5)

        x = jax.random.normal(k_x, (b, n, dim), jnp.float32)
        params = dict(
            w_qkv=jax.random.normal(k_qkv, (dim, 3 * inner), jnp.float32) * 0.05,
            w_out=jax.random.normal(k_out, (inner, dim), jnp.float32) * 0.05,
            b_out=jax.random.normal(k_b, (1, dim), jnp.float32) * 0.05,
        )

        for axis in (0, 1):
            fwd = jax.jit(functools.partial(
                sparse_axial_causal_attention,
                seq_len=seq_len, image_size=image_size, axis=axis,
                heads=heads, dim_head=dim_head))

            out = jax.block_until_ready(fwd(x, params))
            ref = jax.block_until_ready(
                reference_forward(x, params, seq_len=seq_len,
                                  image_size=image_size, axis=axis,
                                  heads=heads, dim_head=dim_head))

            assert out.shape == (b, n, dim), out.shape
            err = float(jnp.max(jnp.abs(out.astype(jnp.float32) - ref)))
            max_err_seen = max(max_err_seen, err)
            if err > 2e-2:
                raise AssertionError(
                    f"heads={heads} dim_head={dim_head} axis={axis}: "
                    f"Pallas output mismatch, max abs err = {err}")

    print("KERNEL_OK")
</pallas_src>

<mosaic_0001>
module attributes {stable_mosaic.version = 11 : i64} {
  func.func @_matmul_kernel(%arg0: i32, %arg1: i32, %arg2: i32, %arg3: memref<48x32xf32, #tpu.memory_space<vmem>>, %arg4: memref<32x512xf32, #tpu.memory_space<vmem>>, %arg5: memref<48x512xbf16, #tpu.memory_space<vmem>>, %arg6: memref<48x512xf32, #tpu.memory_space<vmem>>) attributes {dimension_semantics = [#tpu.dimension_semantics<parallel>, #tpu.dimension_semantics<parallel>, #tpu.dimension_semantics<arbitrary>], iteration_bounds = array<i64: 1, 2, 1>, scalar_prefetch = 0 : i64, scratch_operands = 1 : i64, tpu.core_type = #tpu.core_type<tc>, window_params = [{transform_indices = @transform_0, window_bounds = array<i64: 48, 32>}, {transform_indices = @transform_1, window_bounds = array<i64: 32, 512>}, {transform_indices = @transform_2, window_bounds = array<i64: 48, 512>}]} {
    %c0_i32 = arith.constant 0 : i32
    %0 = arith.cmpi eq, %arg2, %c0_i32 : i32
    %1 = arith.extui %0 : i1 to i32
    %c0_i32_0 = arith.constant 0 : i32
    %2 = arith.cmpi ne, %1, %c0_i32_0 : i32
    scf.if %2 {
      %cst_10 = arith.constant 0.000000e+00 : f32
      %14 = vector.broadcast %cst_10 : f32 to vector<48x512xf32>
      %c0_11 = arith.constant 0 : index
      %c0_12 = arith.constant 0 : index
      %15 = vector.load %arg6[%c0_11, %c0_12] : memref<48x512xf32, #tpu.memory_space<vmem>>, vector<48x512xf32>
      tpu.vector_store %arg6[%c0_11, %c0_12], %14 {strides = array<i32>} : memref<48x512xf32, #tpu.memory_space<vmem>>, vector<48x512xf32>,
    } else {
    }
    %c0 = arith.constant 0 : index
    %c0_1 = arith.constant 0 : index
    %3 = vector.load %arg3[%c0, %c0_1] : memref<48x32xf32, #tpu.memory_space<vmem>>, vector<48x32xf32>
    %c0_2 = arith.constant 0 : index
    %c0_3 = arith.constant 0 : index
    %4 = vector.load %arg4[%c0_2, %c0_3] : memref<32x512xf32, #tpu.memory_space<vmem>>, vector<32x512xf32>
    %5 = arith.truncf %3 : vector<48x32xf32> to vector<48x32xbf16>
    %6 = arith.truncf %4 : vector<32x512xf32> to vector<32x512xbf16>
    %c0_4 = arith.constant 0 : index
    %c0_5 = arith.constant 0 : index
    %7 = vector.load %arg6[%c0_4, %c0_5] : memref<48x512xf32, #tpu.memory_space<vmem>>, vector<48x512xf32>
    %cst = arith.constant dense<0.000000e+00> : vector<48x512xf32>
    %8 = tpu.matmul %5, %6, %cst {dimension_numbers = #tpu.dot_dimension_numbers<[1], [0], [0], [1], [0, 0, 1, 1], [], []>} : vector<48x32xbf16>, vector<32x512xbf16>, vector<48x512xf32> -> vector<48x512xf32>
    %9 = arith.addf %7, %8 : vector<48x512xf32>
    %c0_6 = arith.constant 0 : index
    %c0_7 = arith.constant 0 : index
    %10 = vector.load %arg6[%c0_6, %c0_7] : memref<48x512xf32, #tpu.memory_space<vmem>>, vector<48x512xf32>
    tpu.vector_store %arg6[%c0_6, %c0_7], %9 {strides = array<i32>} : memref<48x512xf32, #tpu.memory_space<vmem>>, vector<48x512xf32>,
    %c0_i32_8 = arith.constant 0 : i32
    %11 = arith.cmpi eq, %arg2, %c0_i32_8 : i32
    %12 = arith.extui %11 : i1 to i32
    %c0_i32_9 = arith.constant 0 : i32
    %13 = arith.cmpi ne, %12, %c0_i32_9 : i32
    scf.if %13 {
      %c0_10 = arith.constant 0 : index
      %c0_11 = arith.constant 0 : index
      %14 = vector.load %arg6[%c0_10, %c0_11] : memref<48x512xf32, #tpu.memory_space<vmem>>, vector<48x512xf32>
      %15 = arith.truncf %14 : vector<48x512xf32> to vector<48x512xbf16>
      %c0_12 = arith.constant 0 : index
      %c0_13 = arith.constant 0 : index
      %16 = vector.load %arg5[%c0_12, %c0_13] : memref<48x512xbf16, #tpu.memory_space<vmem>>, vector<48x512xbf16>
      tpu.vector_store %arg5[%c0_12, %c0_13], %15 {strides = array<i32>} : memref<48x512xbf16, #tpu.memory_space<vmem>>, vector<48x512xbf16>,
    } else {
    }
    return
  }
  func.func @transform_0(%arg0: i32, %arg1: i32, %arg2: i32) -> (i32, i32) {
    %c0_i32 = arith.constant 0 : i32
    return %arg0, %arg2 : i32, i32
  }
  func.func @transform_1(%arg0: i32, %arg1: i32, %arg2: i32) -> (i32, i32) {
    %c0_i32 = arith.constant 0 : i32
    return %arg2, %arg1 : i32, i32
  }
  func.func @transform_2(%arg0: i32, %arg1: i32, %arg2: i32) -> (i32, i32) {
    %c0_i32 = arith.constant 0 : i32
    return %arg0, %arg1 : i32, i32
  }
}

module attributes {stable_mosaic.version = 11 : i64} {
  func.func @_matmul_bias_kernel(%arg0: i32, %arg1: i32, %arg2: i32, %arg3: memref<48x256xbf16, #tpu.memory_space<vmem>>, %arg4: memref<256x32xbf16, #tpu.memory_space<vmem>>, %arg5: memref<1x32xf32, #tpu.memory_space<vmem>>, %arg6: memref<48x32xf32, #tpu.memory_space<vmem>>, %arg7: memref<48x32xf32, #tpu.memory_space<vmem>>) attributes {dimension_semantics = [#tpu.dimension_semantics<parallel>, #tpu.dimension_semantics<parallel>, #tpu.dimension_semantics<arbitrary>], iteration_bounds = array<i64: 1, 1, 1>, scalar_prefetch = 0 : i64, scratch_operands = 1 : i64, tpu.core_type = #tpu.core_type<tc>, window_params = [{transform_indices = @transform_0, window_bounds = array<i64: 48, 256>}, {transform_indices = @transform_1, window_bounds = array<i64: 256, 32>}, {transform_indices = @transform_2, window_bounds = array<i64: 1, 32>}, {transform_indices = @transform_3, window_bounds = array<i64: 48, 32>}]} {
    %c0_i32 = arith.constant 0 : i32
    %0 = arith.cmpi eq, %arg2, %c0_i32 : i32
    %1 = arith.extui %0 : i1 to i32
    %c0_i32_0 = arith.constant 0 : i32
    %2 = arith.cmpi ne, %1, %c0_i32_0 : i32
    scf.if %2 {
      %cst_10 = arith.constant 0.000000e+00 : f32
      %12 = vector.broadcast %cst_10 : f32 to vector<48x32xf32>
      %c0_11 = arith.constant 0 : index
      %c0_12 = arith.constant 0 : index
      %13 = vector.load %arg7[%c0_11, %c0_12] : memref<48x32xf32, #tpu.memory_space<vmem>>, vector<48x32xf32>
      tpu.vector_store %arg7[%c0_11, %c0_12], %12 {strides = array<i32>} : memref<48x32xf32, #tpu.memory_space<vmem>>, vector<48x32xf32>,
    } else {
    }
    %c0 = arith.constant 0 : index
    %c0_1 = arith.constant 0 : index
    %3 = vector.load %arg3[%c0, %c0_1] : memref<48x256xbf16, #tpu.memory_space<vmem>>, vector<48x256xbf16>
    %c0_2 = arith.constant 0 : index
    %c0_3 = arith.constant 0 : index
    %4 = vector.load %arg4[%c0_2, %c0_3] : memref<256x32xbf16, #tpu.memory_space<vmem>>, vector<256x32xbf16>
    %c0_4 = arith.constant 0 : index
    %c0_5 = arith.constant 0 : index
    %5 = vector.load %arg7[%c0_4, %c0_5] : memref<48x32xf32, #tpu.memory_space<vmem>>, vector<48x32xf32>
    %cst = arith.constant dense<0.000000e+00> : vector<48x32xf32>
    %6 = tpu.matmul %3, %4, %cst {dimension_numbers = #tpu.dot_dimension_numbers<[1], [0], [0], [1], [0, 0, 1, 1], [], []>} : vector<48x256xbf16>, vector<256x32xbf16>, vector<48x32xf32> -> vector<48x32xf32>
    %7 = arith.addf %5, %6 : vector<48x32xf32>
    %c0_6 = arith.constant 0 : index
    %c0_7 = arith.constant 0 : index
    %8 = vector.load %arg7[%c0_6, %c0_7] : memref<48x32xf32, #tpu.memory_space<vmem>>, vector<48x32xf32>
    tpu.vector_store %arg7[%c0_6, %c0_7], %7 {strides = array<i32>} : memref<48x32xf32, #tpu.memory_space<vmem>>, vector<48x32xf32>,
    %c0_i32_8 = arith.constant 0 : i32
    %9 = arith.cmpi eq, %arg2, %c0_i32_8 : i32
    %10 = arith.extui %9 : i1 to i32
    %c0_i32_9 = arith.constant 0 : i32
    %11 = arith.cmpi ne, %10, %c0_i32_9 : i32
    scf.if %11 {
      %c0_10 = arith.constant 0 : index
      %c0_11 = arith.constant 0 : index
      %12 = vector.load %arg7[%c0_10, %c0_11] : memref<48x32xf32, #tpu.memory_space<vmem>>, vector<48x32xf32>
      %c0_12 = arith.constant 0 : index
      %c0_13 = arith.constant 0 : index
      %13 = vector.load %arg5[%c0_12, %c0_13] : memref<1x32xf32, #tpu.memory_space<vmem>>, vector<1x32xf32>
      %14 = vector.broadcast %13 : vector<1x32xf32> to vector<48x32xf32>
      %15 = arith.addf %12, %14 : vector<48x32xf32>
      %c0_14 = arith.constant 0 : index
      %c0_15 = arith.constant 0 : index
      %16 = vector.load %arg6[%c0_14, %c0_15] : memref<48x32xf32, #tpu.memory_space<vmem>>, vector<48x32xf32>
      tpu.vector_store %arg6[%c0_14, %c0_15], %15 {strides = array<i32>} : memref<48x32xf32, #tpu.memory_space<vmem>>, vector<48x32xf32>,
    } else {
    }
    return
  }
  func.func @transform_0(%arg0: i32, %arg1: i32, %arg2: i32) -> (i32, i32) {
    %c0_i32 = arith.constant 0 : i32
    return %arg0, %arg2 : i32, i32
  }
  func.func @transform_1(%arg0: i32, %arg1: i32, %arg2: i32) -> (i32, i32) {
    %c0_i32 = arith.constant 0 : i32
    return %arg2, %arg1 : i32, i32
  }
  func.func @transform_2(%arg0: i32, %arg1: i32, %arg2: i32) -> (i32, i32) {
    %c0_i32 = arith.constant 0 : i32
    %c0_i32_0 = arith.constant 0 : i32
    return %c0_i32, %arg1 : i32, i32
  }
  func.func @transform_3(%arg0: i32, %arg1: i32, %arg2: i32) -> (i32, i32) {
    %c0_i32 = arith.constant 0 : i32
    return %arg0, %arg1 : i32, i32
  }
}

module attributes {stable_mosaic.version = 11 : i64} {
  func.func @_fused_attn_kernel(%arg0: i32, %arg1: i32, %arg2: memref<1x24x128xbf16, #tpu.memory_space<vmem>>, %arg3: memref<1x24x128xbf16, #tpu.memory_space<vmem>>, %arg4: memref<1x24x128xbf16, #tpu.memory_space<vmem>>, %arg5: memref<1x24x128xbf16, #tpu.memory_space<vmem>>) attributes {dimension_semantics = [#tpu.dimension_semantics<parallel>, #tpu.dimension_semantics<parallel>], iteration_bounds = array<i64: 2, 2>, scalar_prefetch = 0 : i64, scratch_operands = 0 : i64, tpu.core_type = #tpu.core_type<tc>, window_params = [{transform_indices = @transform_0, window_bounds = array<i64: 1, 24, 128>}, {transform_indices = @transform_1, window_bounds = array<i64: 1, 24, 128>}, {transform_indices = @transform_2, window_bounds = array<i64: 1, 24, 128>}, {transform_indices = @transform_3, window_bounds = array<i64: 1, 24, 128>}]} {
    %c0 = arith.constant 0 : index
    %c0_0 = arith.constant 0 : index
    %c0_1 = arith.constant 0 : index
    %0 = vector.load %arg2[%c0, %c0_0, %c0_1] : memref<1x24x128xbf16, #tpu.memory_space<vmem>>, vector<1x24x128xbf16>
    %1 = vector.shape_cast %0 : vector<1x24x128xbf16> to vector<24x128xbf16>
    %2 = vector.extract_strided_slice %1 {offsets = [0, 0], sizes = [24, 64], strides = [1, 1]} : vector<24x128xbf16> to vector<24x64xbf16>
    %3 = vector.shape_cast %2 : vector<24x64xbf16> to vector<1x24x64xbf16>
    %4 = vector.extract_strided_slice %1 {offsets = [0, 64], sizes = [24, 64], strides = [1, 1]} : vector<24x128xbf16> to vector<24x64xbf16>
    %5 = vector.shape_cast %4 : vector<24x64xbf16> to vector<1x24x64xbf16>
    %6 = tpu.concatenate %3, %5 in 0 : vector<1x24x64xbf16>, vector<1x24x64xbf16> -> vector<2x24x64xbf16>
    %cst = arith.constant 1.250000e-01 : bf16
    %7 = vector.broadcast %cst : bf16 to vector<2x24x64xbf16>
    %8 = arith.mulf %6, %7 : vector<2x24x64xbf16>
    %c0_2 = arith.constant 0 : index
    %c0_3 = arith.constant 0 : index
    %c0_4 = arith.constant 0 : index
    %9 = vector.load %arg3[%c0_2, %c0_3, %c0_4] : memref<1x24x128xbf16, #tpu.memory_space<vmem>>, vector<1x24x128xbf16>
    %10 = vector.shape_cast %9 : vector<1x24x128xbf16> to vector<24x128xbf16>
    %11 = vector.extract_strided_slice %10 {offsets = [0, 0], sizes = [24, 64], strides = [1, 1]} : vector<24x128xbf16> to vector<24x64xbf16>
    %12 = vector.shape_cast %11 : vector<24x64xbf16> to vector<1x24x64xbf16>
    %13 = vector.extract_strided_slice %10 {offsets = [0, 64], sizes = [24, 64], strides = [1, 1]} : vector<24x128xbf16> to vector<24x64xbf16>
    %14 = vector.shape_cast %13 : vector<24x64xbf16> to vector<1x24x64xbf16>
    %15 = tpu.concatenate %12, %14 in 0 : vector<1x24x64xbf16>, vector<1x24x64xbf16> -> vector<2x24x64xbf16>
    %c0_5 = arith.constant 0 : index
    %c0_6 = arith.constant 0 : index
    %c0_7 = arith.constant 0 : index
    %16 = vector.load %arg4[%c0_5, %c0_6, %c0_7] : memref<1x24x128xbf16, #tpu.memory_space<vmem>>, vector<1x24x128xbf16>
    %17 = vector.shape_cast %16 : vector<1x24x128xbf16> to vector<24x128xbf16>
    %18 = vector.extract_strided_slice %17 {offsets = [0, 0], sizes = [24, 64], strides = [1, 1]} : vector<24x128xbf16> to vector<24x64xbf16>
    %19 = vector.shape_cast %18 : vector<24x64xbf16> to vector<1x24x64xbf16>
    %20 = vector.extract_strided_slice %17 {offsets = [0, 64], sizes = [24, 64], strides = [1, 1]} : vector<24x128xbf16> to vector<24x64xbf16>
    %21 = vector.shape_cast %20 : vector<24x64xbf16> to vector<1x24x64xbf16>
    %22 = tpu.concatenate %19, %21 in 0 : vector<1x24x64xbf16>, vector<1x24x64xbf16> -> vector<2x24x64xbf16>
    %23 = vector.extract_strided_slice %8 {offsets = [0, 0, 0], sizes = [2, 8, 64], strides = [1, 1, 1]} : vector<2x24x64xbf16> to vector<2x8x64xbf16>
    %24 = vector.extract_strided_slice %8 {offsets = [0, 8, 0], sizes = [2, 16, 64], strides = [1, 1, 1]} : vector<2x24x64xbf16> to vector<2x16x64xbf16>
    %25 = vector.extract_strided_slice %15 {offsets = [0, 0, 0], sizes = [2, 8, 64], strides = [1, 1, 1]} : vector<2x24x64xbf16> to vector<2x8x64xbf16>
    %26 = vector.extract_strided_slice %15 {offsets = [0, 8, 0], sizes = [2, 16, 64], strides = [1, 1, 1]} : vector<2x24x64xbf16> to vector<2x16x64xbf16>
    %27 = vector.extract_strided_slice %22 {offsets = [0, 0, 0], sizes = [2, 8, 64], strides = [1, 1, 1]} : vector<2x24x64xbf16> to vector<2x8x64xbf16>
    %28 = vector.extract_strided_slice %22 {offsets = [0, 8, 0], sizes = [2, 16, 64], strides = [1, 1, 1]} : vector<2x24x64xbf16> to vector<2x16x64xbf16>
    %cst_8 = arith.constant dense<0.000000e+00> : vector<2x8x8xf32>
    %29 = tpu.matmul %23, %25, %cst_8 {dimension_numbers = #tpu.dot_dimension_numbers<[2], [2], [1], [1], [0, 0, 0, 1, 1, 1], [0], [0]>} : vector<2x8x64xbf16>, vector<2x8x64xbf16>, vector<2x8x8xf32> -> vector<2x8x8xf32>
    %30 = tpu.iota {dimensions = array<i32: 0>} : vector<8x8xi32>
    %31 = tpu.iota {dimensions = array<i32: 1>} : vector<8x8xi32>
    %32 = arith.cmpi sgt, %31, %30 : vector<8x8xi32>
    %33 = vector.shape_cast %32 : vector<8x8xi1> to vector<1x8x8xi1>
    %cst_9 = arith.constant -3.40282347E+38 : f32
    %34 = vector.shape_cast %33 : vector<1x8x8xi1> to vector<1x8x8xi1>
    %35 = vector.broadcast %34 : vector<1x8x8xi1> to vector<2x8x8xi1>
    %36 = vector.broadcast %cst_9 : f32 to vector<2x8x8xf32>
    %37 = arith.select %35, %36, %29 : vector<2x8x8xi1>, vector<2x8x8xf32>
    %cst_10 = arith.constant dense<0xFF800000> : vector<2x8xf32>
    %38 = vector.multi_reduction <maximumf>, %37, %cst_10 [2] : vector<2x8x8xf32> to vector<2x8xf32>
    %39 = vector.shape_cast %38 : vector<2x8xf32> to vector<2x8x1xf32>
    %40 = vector.broadcast %39 : vector<2x8x1xf32> to vector<2x8x8xf32>
    %41 = arith.subf %37, %40 : vector<2x8x8xf32>
    %42 = math.exp %41 : vector<2x8x8xf32>
    %cst_11 = arith.constant dense<0.000000e+00> : vector<2x8xf32>
    %43 = vector.multi_reduction <add>, %42, %cst_11 [2] : vector<2x8x8xf32> to vector<2x8xf32>
    %44 = vector.shape_cast %43 : vector<2x8xf32> to vector<2x8x1xf32>
    %45 = tpu.reciprocal %44 {approx = true} : vector<2x8x1xf32> -> vector<2x8x1xf32>
    %46 = arith.truncf %42 : vector<2x8x8xf32> to vector<2x8x8xbf16>
    %cst_12 = arith.constant dense<0.000000e+00> : vector<2x8x64xf32>
    %47 = tpu.matmul %46, %27, %cst_12 {dimension_numbers = #tpu.dot_dimension_numbers<[2], [1], [1], [2], [0, 0, 0, 1, 1, 2], [0], [0]>} : vector<2x8x8xbf16>, vector<2x8x64xbf16>, vector<2x8x64xf32> -> vector<2x8x64xf32>
    %48 = vector.broadcast %45 : vector<2x8x1xf32> to vector<2x8x64xf32>
    %49 = arith.mulf %47, %48 : vector<2x8x64xf32>
    %50 = vector.shape_cast %24 : vector<2x16x64xbf16> to vector<2x4x4x64xbf16>
    %51 = vector.shape_cast %50 : vector<2x4x4x64xbf16> to vector<8x4x64xbf16>
    %52 = vector.shape_cast %26 : vector<2x16x64xbf16> to vector<2x4x4x64xbf16>
    %53 = vector.shape_cast %52 : vector<2x4x4x64xbf16> to vector<8x4x64xbf16>
    %54 = vector.shape_cast %28 : vector<2x16x64xbf16> to vector<2x4x4x64xbf16>
    %55 = vector.shape_cast %54 : vector<2x4x4x64xbf16> to vector<8x4x64xbf16>
    %56 = vector.shape_cast %51 : vector<8x4x64xbf16> to vector<2x16x64xbf16>
    %cst_13 = arith.constant dense<0.000000e+00> : vector<8x4x4xf32>
    %57 = tpu.matmul %51, %53, %cst_13 {dimension_numbers = #tpu.dot_dimension_numbers<[2], [2], [1], [1], [0, 0, 0, 1, 1, 1], [0], [0]>} : vector<8x4x64xbf16>, vector<8x4x64xbf16>, vector<8x4x4xf32> -> vector<8x4x4xf32>
    %cst_14 = arith.constant dense<0.000000e+00> : vector<2x16x8xf32>
    %58 = tpu.matmul %56, %25, %cst_14 {dimension_numbers = #tpu.dot_dimension_numbers<[2], [2], [1], [1], [0, 0, 0, 1, 1, 1], [0], [0]>} : vector<2x16x64xbf16>, vector<2x8x64xbf16>, vector<2x16x8xf32> -> vector<2x16x8xf32>
    %59 = vector.shape_cast %58 : vector<2x16x8xf32> to vector<8x4x8xf32>
    %60 = tpu.iota {dimensions = array<i32: 0>} : vector<4x4xi32>
    %61 = tpu.iota {dimensions = array<i32: 1>} : vector<4x4xi32>
    %62 = arith.cmpi sgt, %61, %60 : vector<4x4xi32>
    %63 = vector.shape_cast %62 : vector<4x4xi1> to vector<1x4x4xi1>
    %cst_15 = arith.constant -3.40282347E+38 : f32
    %64 = vector.shape_cast %63 : vector<1x4x4xi1> to vector<1x4x4xi1>
    %65 = vector.broadcast %64 : vector<1x4x4xi1> to vector<8x4x4xi1>
    %66 = vector.broadcast %cst_15 : f32 to vector<8x4x4xf32>
    %67 = arith.select %65, %66, %57 : vector<8x4x4xi1>, vector<8x4x4xf32>
    %cst_16 = arith.constant dense<0xFF800000> : vector<8x4xf32>
    %68 = vector.multi_reduction <maximumf>, %67, %cst_16 [2] : vector<8x4x4xf32> to vector<8x4xf32>
    %69 = vector.shape_cast %68 : vector<8x4xf32> to vector<8x4x1xf32>
    %cst_17 = arith.constant dense<0xFF800000> : vector<8x4xf32>
    %70 = vector.multi_reduction <maximumf>, %59, %cst_17 [2] : vector<8x4x8xf32> to vector<8x4xf32>
    %71 = vector.shape_cast %70 : vector<8x4xf32> to vector<8x4x1xf32>
    %72 = arith.maximumf %69, %71 : vector<8x4x1xf32>
    %73 = vector.broadcast %72 : vector<8x4x1xf32> to vector<8x4x4xf32>
    %74 = arith.subf %67, %73 : vector<8x4x4xf32>
    %75 = math.exp %74 : vector<8x4x4xf32>
    %76 = vector.broadcast %72 : vector<8x4x1xf32> to vector<8x4x8xf32>
    %77 = arith.subf %59, %76 : vector<8x4x8xf32>
    %78 = math.exp %77 : vector<8x4x8xf32>
    %cst_18 = arith.constant dense<0.000000e+00> : vector<8x4xf32>
    %79 = vector.multi_reduction <add>, %75, %cst_18 [2] : vector<8x4x4xf32> to vector<8x4xf32>
    %80 = vector.shape_cast %79 : vector<8x4xf32> to vector<8x4x1xf32>
    %cst_19 = arith.constant dense<0.000000e+00> : vector<8x4xf32>
    %81 = vector.multi_reduction <add>, %78, %cst_19 [2] : vector<8x4x8xf32> to vector<8x4xf32>
    %82 = vector.shape_cast %81 : vector<8x4xf32> to vector<8x4x1xf32>
    %83 = arith.addf %80, %82 : vector<8x4x1xf32>
    %84 = tpu.reciprocal %83 {approx = true} : vector<8x4x1xf32> -> vector<8x4x1xf32>
    %85 = arith.truncf %75 : vector<8x4x4xf32> to vector<8x4x4xbf16>
    %cst_20 = arith.constant dense<0.000000e+00> : vector<8x4x64xf32>
    %86 = tpu.matmul %85, %55, %cst_20 {dimension_numbers = #tpu.dot_dimension_numbers<[2], [1], [1], [2], [0, 0, 0, 1, 1, 2], [0], [0]>} : vector<8x4x4xbf16>, vector<8x4x64xbf16>, vector<8x4x64xf32> -> vector<8x4x64xf32>
    %87 = vector.shape_cast %78 : vector<8x4x8xf32> to vector<2x16x8xf32>
    %88 = arith.truncf %87 : vector<2x16x8xf32> to vector<2x16x8xbf16>
    %cst_21 = arith.constant dense<0.000000e+00> : vector<2x16x64xf32>
    %89 = tpu.matmul %88, %27, %cst_21 {dimension_numbers = #tpu.dot_dimension_numbers<[2], [1], [1], [2], [0, 0, 0, 1, 1, 2], [0], [0]>} : vector<2x16x8xbf16>, vector<2x8x64xbf16>, vector<2x16x64xf32> -> vector<2x16x64xf32>
    %90 = vector.shape_cast %89 : vector<2x16x64xf32> to vector<8x4x64xf32>
    %91 = arith.addf %86, %90 : vector<8x4x64xf32>
    %92 = vector.broadcast %84 : vector<8x4x1xf32> to vector<8x4x64xf32>
    %93 = arith.mulf %91, %92 : vector<8x4x64xf32>
    %94 = vector.shape_cast %93 : vector<8x4x64xf32> to vector<2x4x4x64xf32>
    %95 = vector.shape_cast %94 : vector<2x4x4x64xf32> to vector<2x16x64xf32>
    %96 = vector.extract_strided_slice %49 {offsets = [0, 0, 0], sizes = [1, 8, 64], strides = [1, 1, 1]} : vector<2x8x64xf32> to vector<1x8x64xf32>
    %97 = vector.shape_cast %96 : vector<1x8x64xf32> to vector<8x64xf32>
    %98 = vector.extract_strided_slice %49 {offsets = [1, 0, 0], sizes = [1, 8, 64], strides = [1, 1, 1]} : vector<2x8x64xf32> to vector<1x8x64xf32>
    %99 = vector.shape_cast %98 : vector<1x8x64xf32> to vector<8x64xf32>
    %100 = tpu.concatenate %97, %99 in 1 : vector<8x64xf32>, vector<8x64xf32> -> vector<8x128xf32>
    %101 = arith.truncf %100 : vector<8x128xf32> to vector<8x128xbf16>
    %c0_22 = arith.constant 0 : index
    %c0_23 = arith.constant 0 : index
    %c0_24 = arith.constant 0 : index
    %102 = vector.load %arg5[%c0_22, %c0_23, %c0_24] : memref<1x24x128xbf16, #tpu.memory_space<vmem>>, vector<1x8x128xbf16>
    %103 = vector.shape_cast %102 : vector<1x8x128xbf16> to vector<8x128xbf16>
    %104 = vector.shape_cast %101 : vector<8x128xbf16> to vector<1x8x128xbf16>
    tpu.vector_store %arg5[%c0_22, %c0_23, %c0_24], %104 {strides = array<i32>} : memref<1x24x128xbf16, #tpu.memory_space<vmem>>, vector<1x8x128xbf16>,
    %105 = vector.extract_strided_slice %95 {offsets = [0, 0, 0], sizes = [1, 16, 64], strides = [1, 1, 1]} : vector<2x16x64xf32> to vector<1x16x64xf32>
    %106 = vector.shape_cast %105 : vector<1x16x64xf32> to vector<16x64xf32>
    %107 = vector.extract_strided_slice %95 {offsets = [1, 0, 0], sizes = [1, 16, 64], strides = [1, 1, 1]} : vector<2x16x64xf32> to vector<1x16x64xf32>
    %108 = vector.shape_cast %107 : vector<1x16x64xf32> to vector<16x64xf32>
    %109 = tpu.concatenate %106, %108 in 1 : vector<16x64xf32>, vector<16x64xf32> -> vector<16x128xf32>
    %110 = arith.truncf %109 : vector<16x128xf32> to vector<16x128xbf16>
    %c0_25 = arith.constant 0 : index
    %c8 = arith.constant 8 : index
    %c0_26 = arith.constant 0 : index
    %111 = vector.load %arg5[%c0_25, %c8, %c0_26] : memref<1x24x128xbf16, #tpu.memory_space<vmem>>, vector<1x16x128xbf16>
    %112 = vector.shape_cast %111 : vector<1x16x128xbf16> to vector<16x128xbf16>
    %113 = vector.shape_cast %110 : vector<16x128xbf16> to vector<1x16x128xbf16>
    tpu.vector_store %arg5[%c0_25, %c8, %c0_26], %113 {strides = array<i32>} : memref<1x24x128xbf16, #tpu.memory_space<vmem>>, vector<1x16x128xbf16>,
    return
  }
  func.func @transform_0(%arg0: i32, %arg1: i32) -> (i32, i32, i32) {
    %c0_i32 = arith.constant 0 : i32
    %c0_i32_0 = arith.constant 0 : i32
    return %arg0, %c0_i32, %arg1 : i32, i32, i32
  }
  func.func @transform_1(%arg0: i32, %arg1: i32) -> (i32, i32, i32) {
    %c2_i32 = arith.constant 2 : i32
    %0 = arith.addi %c2_i32, %arg1 : i32
    %c0_i32 = arith.constant 0 : i32
    %c0_i32_0 = arith.constant 0 : i32
    return %arg0, %c0_i32, %0 : i32, i32, i32
  }
  func.func @transform_2(%arg0: i32, %arg1: i32) -> (i32, i32, i32) {
    %c4_i32 = arith.constant 4 : i32
    %0 = arith.addi %c4_i32, %arg1 : i32
    %c0_i32 = arith.constant 0 : i32
    %c0_i32_0 = arith.constant 0 : i32
    return %arg0, %c0_i32, %0 : i32, i32, i32
  }
  func.func @transform_3(%arg0: i32, %arg1: i32) -> (i32, i32, i32) {
    %c0_i32 = arith.constant 0 : i32
    %c0_i32_0 = arith.constant 0 : i32
    return %arg0, %c0_i32, %arg1 : i32, i32, i32
  }
}

</mosaic_0001>

<bundles_post_ra>
// kernel: sparse_axial_causal_attention.3
= control target key start
LH: loop header
LB: loop body
LE: loop exit
PB: predicated region body
PF: predicated region fallthrough
CT: control target
= control target key end

     0   :  { %s2073_s9 = smov 0   ;;  %s2075_s10 = smov 0   ;;  %s2576_s0 = inlined_call_operand.vmem [shape: f32[48,32], index: 0, kind: input, shape index: {}]   ;;  %s2577_s1 = inlined_call_operand.vmem [shape: f32[32,768], index: 1, kind: input, shape index: {}]   ;;  %s2578_s2 = inlined_call_operand.vmem [shape: bf16[48,768], index: 2, kind: output, shape index: {}]  }
   0x1   :  { %s2077_s11 = smov 0   ;;  %s2079_s12 = smov 0  }
   0x2   :  { %s2081_s13 = smov 0  }
   0x3 LB: > { %s27_s14 = sadd.s32 1, %s1952_s12  ;;  %s1398_s15 = sadd.s32 4294967295, %s1956_s13   ;;  %s1956_s13 = sphi %s2081_s13, %s12_s13   ;;  %s1952_s12 = sphi %s2079_s12, %s2604_s12   ;;  %s1948_s11 = sphi %s2077_s11, %s2603_s11   ;;  %s1944_s10 = sphi %s2075_s10, %s2602_s10   ;;  %s1940_s9 = sphi %s2073_s9, %s2601_s9  }
   0x4   : > { %p29_p0 = scmp.ge.s32.totalorder %s27_s14, 2  ;;  %p75_p1 = scmp.ne.s32.totalorder %s1944_s10, %s1940_s9 }
   0x5   : > { %p76_p2 = scmp.eq.s32.totalorder %s1956_s13, 0  ;;  %p107_p4 = scmp.eq.s32.totalorder %s1398_s15, 1 }
   0x6   : > { %s2606_s14 = smov (%p29_p0, %s27_s14), 0  ;;  %s68_s17 = sadd.s32 1, %s1944_s10 }
   0x7   : > { %p77_p3 = por %p76_p2, %p75_p1  ;;  %s64_s16 = ssub.s32 %s1952_s12, %s2606_s14 }
   0x8   : > { %p66_p5 = scmp.eq.s32.totalorder %s64_s16, 0  ;;  %p2108_p6 = por %p107_p4, %p75_p1 }
   0x9   : > { %p1402_p7 = scmp.ge.s32.totalorder %s1956_s13, 2 }
   0xa   : > { %s2113_s19 = scalar_select %p66_p5, %s1944_s10, %s68_s17  }
   0xb   : > { %141 = sbr.rel (%p1402_p7) target bundleno = 93 (0x5d), region = 20 }
  0x10   : > { %144 = sbr.rel (!%p77_p3) target bundleno = 93 (0x5d), region = 24  ;;  %s146_s20 = sand.u32 (%p77_p3), 1, %s1944_s10  }
  0x11   : > { %s1404_s21 = sshll.u32 (%p77_p3), %s1952_s12, 2  ;;  %s1403_s22 = sshll.u32 (%p77_p3), %s146_s20, 7 }
  0x12   : > { %s151_s23 = ssub.s32 (%p77_p3), 6, %s1404_s21  ;;  %s1469_s24 = sshll.u32 (%p77_p3), %s1952_s12, 5 }
  0x13   : > { %p152_p8 = scmp.lt.s32.totalorder (%p77_p3), %s151_s23, 4  ;;  %s2122_s27 = scalar_lea.vmem (%p77_p3), %s2577_s1, %s1469_s24  }
  0x14   : > { %s2126_s30 = scalar_lea.vmem (%p77_p3), [#allocation3], %s1403_s22  }
  0x15   : > { %s2608_s23 = smov (!%p152_p8, %s151_s23), 4 }
  0x16   : > { %s1405_s28 = sshll.u32 %s2608_s23, 5  ;;  %s2124_s29 = sshll.u32 %s2608_s23, 3 }
  0x17   : > { %p1409_p9 = scmp.eq.s32.totalorder %s1405_s28, 0 }
  0x18   : > { %p164_p10 = scmp.lt.u32.totalorder (!%p1409_p9), %s2124_s29, 8 }
  0x19   : > { %163 = sbr.rel (%p1409_p9) target bundleno = 93 (0x5d), region = 28 }
  0x1e   : > { %167 = sbr.rel (%p164_p10) target bundleno = 81 (0x51), region = 32  ;;  %s2130_s3 = sand.u32 (!%p164_p10), 7, %s2124_s29  }
  0x1f   : > { %p190_p11 = scmp.eq.s32.totalorder (!%p164_p10), %s2130_s3, 0  ;;  %p1410_p12 = scmp.ne.s32.totalorder (!%p164_p10), %s2130_s3, 0 }
  0x23   : > { %193 = sbr.rel (%p1410_p12) target bundleno = 53 (0x35), region = 47  ;;  %s194_s4 = sshrl.u32 (!%p1410_p12), %s2124_s29, 3 }
  0x24   : > { %s195_s5 = sshrl.u32 (!%p1410_p12), %s194_s4, 3  ;;  %s2135_s6 = sand.u32 (!%p1410_p12), 7, %s194_s4  }
  0x25   : > { %s1470_s7 = sshll.u32 (!%p1410_p12), %s195_s5, 6  ;;  %p1417_p13 = scmp.le.s32.totalorder (!%p1410_p12), %s2135_s6, 0 }
  0x26   : > { %s2138_s8 = scalar_lea.vmem (!%p1410_p12), %s2122_s27, %s1470_s7   ;;  %s2141_s15 = scalar_lea.vmem (!%p1410_p12), %s2126_s30, %s1470_s7 [#allocation3]  }
  0x28   : > { %1264 = sbr.rel (%p1417_p13) target bundleno = 53 (0x35), region = 247  ;;  %s2580_s16 = smov (!%p1417_p13), %s2141_s15 }
  0x29   : > { %s2581_s17 = smov (!%p1417_p13), %s2138_s8  ;;  %s2150_s20 = smov (!%p1417_p13), 0  }
  0x2a   : > { %s1970_s21 = smov (!%p1417_p13), 0  }
  0x2d LB: >> { %v292_v0 = vld [vmem:[%s1964_s17] sm:$0xff]  ;;  %v294_v1 = vld [vmem:[%s1964_s17 + $0x30] sm:$0xff]  ;;  %s300_s22 = sadd.s32 1, %s1968_s20  ;;  %s286_s21 = sadd.s32 1, %s1972_s21   ;;  %s1972_s21 = sphi %s1970_s21, %s286_s21   ;;  %s1968_s20 = sphi %s2150_s20, %s2582_s20   ;;  %s1964_s17 = sphi %s2581_s17, %s305_s17   ;;  %s1960_s16 = sphi %s2580_s16, %s306_s16  }
  0x2e   : >> { %v296_v2 = vld [vmem:[%s1964_s17 + $0x60] sm:$0xff]  ;;  %293 = vst [vmem:[%s1960_s16] sm:$0xff] %v292_v0  ;;  %v298_v3 = vld [vmem:[%s1964_s17 + $0x90] sm:$0xff]  ;;  %p301_p0 = scmp.ge.s32.totalorder %s300_s22, %s2135_s6  ;;  %p285_p1 = scmp.ge.s32.totalorder %s286_s21, %s2135_s6 }
  0x2f   : >> { %295 = vst [vmem:[%s1960_s16 + $0x20] sm:$0xff] %v294_v1 }
  0x30   : >> { %297 = vst [vmem:[%s1960_s16 + $0x40] sm:$0xff] %v296_v2  ;;  %s2610_s22 = smov (%p301_p0, %s300_s22), 0  ;;  %288 = sbr.rel (!%p285_p1) target bundleno = 45 (0x2d), region = 253 }
  0x31   : >> { %299 = vst [vmem:[%s1960_s16 + $0x60] sm:$0xff] %v298_v3  ;;  %s1418_s23 = sshll.u32 %s2610_s22, 3  ;;  %s2582_s20 = smov %s2610_s22 }
  0x32   : >> { %s305_s17 = scalar_lea.vmem %s2138_s8, %s1418_s23   ;;  %s306_s16 = scalar_lea.vmem %s2141_s15, %s1418_s23 [#allocation3]  }
  0x35 PF: > { %309 = sbr.rel (%p190_p11) target bundleno = 81 (0x51), region = 65  ;;  %s311_s24 = ssub.s32 (!%p190_p11), %s2124_s29, %s2130_s3 }
  0x36   : > { %s315_s25 = sshrl.u32 (!%p190_p11), %s2124_s29, 3  ;;  %s2171_s26 = scalar_lea.vmem (!%p190_p11), %s2122_s27, %s311_s24 }
  0x37   : > { %s2174_s28 = scalar_lea.vmem (!%p190_p11), %s2126_s30, %s311_s24 [#allocation3]  ;;  %s316_s4 = sshrl.u32 (!%p190_p11), %s315_s25, 3 }
  0x38   : > { %s2176_s5 = sand.u32 (!%p190_p11), 7, %s315_s25   ;;  %s1472_s6 = sshll.u32 (!%p190_p11), %s316_s4, 6 }
  0x39   : > { %s2179_s7 = scalar_lea.vmem (!%p190_p11), %s2122_s27, %s1472_s6   ;;  %s2182_s8 = scalar_lea.vmem (!%p190_p11), %s2126_s30, %s1472_s6 [#allocation3]  }
  0x3a   : > { %p1426_p2 = scmp.le.s32.totalorder %s2176_s5, 0 }
  0x3b   : > { %s2583_s15 = smov (!%p1426_p2), %s2182_s8  ;;  %s2584_s16 = smov (!%p1426_p2), %s2179_s7 }
  0x3c   : > { %1292 = sbr.rel (%p1426_p2) target bundleno = 73 (0x49), region = 269  ;;  %s1982_s17 = smov (!%p1426_p2), 0  }
  0x3d   : > { %s1986_s20 = smov (!%p1426_p2), 0  }
  0x41 LB: >> { %v413_v4 = vld [vmem:[%s1980_s16] sm:$0xff]  ;;  %v415_v5 = vld [vmem:[%s1980_s16 + $0x30] sm:$0xff]  ;;  %s421_s21 = sadd.s32 1, %s1984_s17  ;;  %s407_s20 = sadd.s32 1, %s1988_s20   ;;  %s1988_s20 = sphi %s1986_s20, %s407_s20   ;;  %s1984_s17 = sphi %s1982_s17, %s1983_s17   ;;  %s1980_s16 = sphi %s2584_s16, %s426_s16   ;;  %s1976_s15 = sphi %s2583_s15, %s427_s15  }
  0x42   : >> { %v417_v6 = vld [vmem:[%s1980_s16 + $0x60] sm:$0xff]  ;;  %414 = vst [vmem:[%s1976_s15] sm:$0xff] %v413_v4  ;;  %v419_v7 = vld [vmem:[%s1980_s16 + $0x90] sm:$0xff]  ;;  %p422_p3 = scmp.ge.s32.totalorder %s421_s21, %s2176_s5  ;;  %p406_p4 = scmp.ge.s32.totalorder %s407_s20, %s2176_s5 }
  0x43   : >> { %416 = vst [vmem:[%s1976_s15 + $0x20] sm:$0xff] %v415_v5 }
  0x44   : >> { %418 = vst [vmem:[%s1976_s15 + $0x40] sm:$0xff] %v417_v6  ;;  %s2612_s21 = smov (%p422_p3, %s421_s21), 0  ;;  %409 = sbr.rel (!%p406_p4) target bundleno = 65 (0x41), region = 275 }
  0x45   : >> { %420 = vst [vmem:[%s1976_s15 + $0x60] sm:$0xff] %v419_v7  ;;  %s1427_s22 = sshll.u32 %s2612_s21, 3  ;;  %s1983_s17 = smov %s2612_s21  }
  0x46   : >> { %s426_s16 = scalar_lea.vmem %s2179_s7, %s1427_s22   ;;  %s427_s15 = scalar_lea.vmem %s2182_s8, %s1427_s22 [#allocation3]  }
  0x49 PF: > { %s2054_s23 = smov 1  }
  0x4a   : > { %s428_s24 = sshll.u32 %s2054_s23, %s2130_s3 }
  0x4b   : > { %s1429_s25 = sadd.s32 4294967295, %s428_s24 }
  0x4c   : > { %v438_v8 = vld [vmem:[%s2171_s26] sm:%s1429_s25]  ;;  %v440_v9 = vld [vmem:[%s2171_s26 + $0x30] sm:%s1429_s25] }
  0x4d   : > { %439 = vst [vmem:[%s2174_s28] sm:%s1429_s25] %v438_v8  ;;  %v442_v10 = vld [vmem:[%s2171_s26 + $0x60] sm:%s1429_s25] }
  0x4e   : > { %441 = vst [vmem:[%s2174_s28 + $0x20] sm:%s1429_s25] %v440_v9  ;;  %v444_v11 = vld [vmem:[%s2171_s26 + $0x90] sm:%s1429_s25] }
  0x4f   : > { %443 = vst [vmem:[%s2174_s28 + $0x40] sm:%s1429_s25] %v442_v10 }
  0x50   : > { %445 = vst [vmem:[%s2174_s28 + $0x60] sm:%s1429_s25] %v444_v11 }
  0x51 PF: > { %p1430_p5 = scmp.ge.u32.totalorder %s2124_s29, 8 }
  0x52   : > { %s2055_s4 = smov (!%p1430_p5), 1  }
  0x53   : > { %170 = sbr.rel (%p1430_p5) target bundleno = 93 (0x5d), region = 36  ;;  %s171_s3 = sshll.u32 (!%p1430_p5), %s2055_s4, %s2124_s29 }
  0x54   : > { %s1431_s5 = sadd.s32 (!%p1430_p5), 4294967295, %s171_s3 }
  0x58   : > { %v181_v12 = vld [vmem:[%s2122_s27] sm:%s1431_s5]  ;;  %v183_v13 = vld [vmem:[%s2122_s27 + $0x30] sm:%s1431_s5] }
  0x59   : > { %182 = vst [vmem:[%s2126_s30] sm:%s1431_s5] %v181_v12  ;;  %v185_v14 = vld [vmem:[%s2122_s27 + $0x60] sm:%s1431_s5] }
  0x5a   : > { %184 = vst [vmem:[%s2126_s30 + $0x20] sm:%s1431_s5] %v183_v13  ;;  %v187_v15 = vld [vmem:[%s2122_s27 + $0x90] sm:%s1431_s5] }
  0x5b   : > { %186 = vst [vmem:[%s2126_s30 + $0x40] sm:%s1431_s5] %v185_v14 }
  0x5c   : > { %188 = vst [vmem:[%s2126_s30 + $0x60] sm:%s1431_s5] %v187_v15 }
  0x5d PF: > { %p1432_p7 = scmp.ge.s32.totalorder %s1956_s13, 1  ;;  %p448_p8 = scmp.lt.s32.totalorder %s1956_s13, 3 }
  0x5f   : > { %p449_p9 = pnand %p1432_p7, %p448_p8 }
  0x60   : > { %s455_s29 = sand.u32 (!%p449_p9), 1, %s1940_s9  }
  0x61   : > { %452 = sbr.rel (%p449_p9) target bundleno = 462 (0x1ce), region = 90  ;;  %s1433_s26 = sshll.u32 (!%p449_p9), %s455_s29, 7 }
  0x62   : > { %s457_s28 = scalar_lea.vmem (!%p449_p9), [#allocation3], %s1433_s26  ;;  %s1475_s24 = smul.u32 (!%p449_p9), 96, %s455_s29 }
  0x64   : > { %s2257_s25 = scalar_lea.vmem (!%p449_p9), [#allocation4], %s1475_s24  }
  0x66   : > { %v547_v16 = vld [vmem:[%s457_s28 + $0x40] sm:$0xff]  ;;  %v548_v18 = vld [vmem:[%s457_s28 + $0x48] sm:$0xff]  ;;  %v549_v21 = vld [vmem:[%s457_s28 + $0x50] sm:$0xff]  ;;  %vm590_vm0 = vcmask 261120   ;;  %s1446_s9 = sshll.u32 (%p2108_p6), %s1948_s11, 2  ;;  %s1474_s4 = sshll.u32 (%p2108_p6), %s1948_s11, 4 }
  0x67   : > { %v551_v17 = vld [vmem:[%s457_s28 + $0x60] sm:$0xff]  ;;  %v552_v20 = vld [vmem:[%s457_s28 + $0x68] sm:$0xff]  ;;  %v553_v22 = vld [vmem:[%s457_s28 + $0x70] sm:$0xff]  ;;  %s804_s3 = ssub.s32 (%p2108_p6), 6, %s1446_s9  ;;  %s2278_s26 = scalar_lea.vmem (%p2108_p6), %s2578_s2, %s1474_s4  }
  0x68   : > { %v562_v19 = vpack.c.bf16 %v551_v17, %v547_v16  ;;  %v533_v23 = vld [vmem:[%s2576_s0] sm:$0xff]  ;;  %v534_v24 = vld [vmem:[%s2576_s0 + $0x8] sm:$0xff]  ;;  %v563_v25 = vpack.c.bf16 %v552_v20, %v548_v18  ;;  %v564_v26 = vpack.c.bf16 %v553_v22, %v549_v21  ;;  %v550_v27 = vld [vmem:[%s457_s28 + $0x58] sm:$0xff]  ;;  %p805_p10 = scmp.lt.s32.totalorder (%p2108_p6), %s804_s3, 4 }
  0x69   : > { %v554_v28 = vld [vmem:[%s457_s28 + $0x78] sm:$0xff]  ;;  %v539_v29 = vld [vmem:[%s457_s28] sm:$0xff]  ;;  %v540_v32 = vld [vmem:[%s457_s28 + $0x8] sm:$0xff]  ;;  %v555_v42 = vpack.c.bf16 %v534_v24, %v533_v23 }
  0x6a   : > { %606 = vmatpush.bf16.msra.mxu0 %v562_v19  ;;  %v565_v30 = vpack.c.bf16 %v554_v28, %v550_v27  ;;  %v543_v31 = vld [vmem:[%s457_s28 + $0x20] sm:$0xff]  ;;  %v544_v33 = vld [vmem:[%s457_s28 + $0x28] sm:$0xff]  ;;  %630 = vmatpush.bf16.msra.mxu1 %v563_v25  ;;  %v541_v36 = vld [vmem:[%s457_s28 + $0x10] sm:$0xff] }
  0x6b   : > { %654 = vmatpush.bf16.msra.mxu2 %v564_v26  ;;  %v558_v34 = vpack.c.bf16 %v543_v31, %v539_v29  ;;  %v559_v35 = vpack.c.bf16 %v544_v33, %v540_v32  ;;  %v545_v37 = vld [vmem:[%s457_s28 + $0x30] sm:$0xff]  ;;  %v542_v38 = vld [vmem:[%s457_s28 + $0x18] sm:$0xff]  ;;  %v537_v46 = vld [vmem:[%s2576_s0 + $0x20] sm:$0xff] }
  0x6c   : > { %678 = vmatpush.bf16.msra.mxu3 %v565_v30  ;;  %v560_v39 = vpack.c.bf16 %v545_v37, %v541_v36  ;;  %v546_v40 = vld [vmem:[%s457_s28 + $0x38] sm:$0xff]  ;;  %v535_v43 = vld [vmem:[%s2576_s0 + $0x10] sm:$0xff]  ;;  %v538_v47 = vld [vmem:[%s2576_s0 + $0x28] sm:$0xff] }
  0x6d   : > { %v561_v41 = vpack.c.bf16 %v546_v40, %v542_v38  ;;  %v536_v44 = vld [vmem:[%s2576_s0 + $0x18] sm:$0xff]  ;;  %v557_v48 = vpack.c.bf16 %v538_v47, %v537_v46 }
  0x6e   : > { %607 = vmatpush.bf16.msra.mxu0 %v558_v34  ;;  %631 = vmatpush.bf16.msra.mxu1 %v559_v35  ;;  %v556_v45 = vpack.c.bf16 %v536_v44, %v535_v43 }
  0x6f   : > { %655 = vmatpush.bf16.msra.mxu2 %v560_v39 }
  0x70   : > { %679 = vmatpush.bf16.msra.mxu3 %v561_v41 }
  0x71   : > { %1434 = vmatmul.msk.bf16.vlgmr.msra.gmra.mxu0 %vm590_vm0, %v555_v42  ;;  %1437 = vmatmul.msk.bf16.vlgmr.msra.gmra.mxu1 %vm590_vm0, %v555_v42 }
  0x72   : > { %1440 = vmatmul.msk.bf16.vlgmr.msra.gmra.mxu2 %vm590_vm0, %v555_v42 }
  0x73   : > { %1443 = vmatmul.msk.bf16.vlgmr.msra.gmra.mxu3 %vm590_vm0, %v555_v42 }
  0x81   : > { %1435 = vmatmul.msk.bf16.gmra.mxu0 %vm590_vm0, %v556_v45  ;;  %1438 = vmatmul.msk.bf16.gmra.mxu1 %vm590_vm0, %v556_v45 }
  0x82   : > { %1441 = vmatmul.msk.bf16.gmra.mxu2 %vm590_vm0, %v556_v45 }
  0x83   : > { %1444 = vmatmul.msk.bf16.gmra.mxu3 %vm590_vm0, %v556_v45 }
  0x91   : > { %1436 = vmatmul.msk.bf16.gmra.mxu0 %vm590_vm0, %v557_v48  ;;  %1439 = vmatmul.msk.bf16.gmra.mxu1 %vm590_vm0, %v557_v48 }
  0x92   : > { %1442 = vmatmul.msk.bf16.gmra.mxu2 %vm590_vm0, %v557_v48 }
  0x93   : > { %1445 = vmatmul.msk.bf16.gmra.mxu3 %vm590_vm0, %v557_v48 }
  0xee   : > { %v609_v49 = vpop.f32.mrf.mxu0  ;;  %v633_v50 = vpop.f32.mrf.mxu1 }
  0xef   : > { %v771_v51 = vpack.c.bf16 %v633_v50, %v609_v49 }
  0xf1   : > { %783 = vst [vmem:[%s2257_s25] sm:$0xff] %v771_v51 }
  0xf5   : > { %v657_v52 = vpop.f32.mrf.mxu2 }
  0xf6   : > { %v681_v53 = vpop.f32.mrf.mxu3  ;;  %v611_v54 = vpop.f32.mrf.mxu0 }
  0xf7   : > { %v772_v55 = vpack.c.bf16 %v681_v53, %v657_v52  ;;  %v635_v56 = vpop.f32.mrf.mxu1 }
  0xf8   : > { %v773_v57 = vpack.c.bf16 %v635_v56, %v611_v54 }
  0xf9   : > { %784 = vst [vmem:[%s2257_s25 + $0x8] sm:$0xff] %v772_v55 }
  0xfa   : > { %785 = vst [vmem:[%s2257_s25 + $0x10] sm:$0xff] %v773_v57 }
  0xfd   : > { %v659_v58 = vpop.f32.mrf.mxu2 }
  0xfe   : > { %v683_v59 = vpop.f32.mrf.mxu3  ;;  %v614_v60 = vpop.f32.mrf.mxu0 }
  0xff   : > { %v774_v61 = vpack.c.bf16 %v683_v59, %v659_v58  ;;  %v638_v62 = vpop.f32.mrf.mxu1 }
 0x100   : > { %v775_v63 = vpack.c.bf16 %v638_v62, %v614_v60 }
 0x101   : > { %786 = vst [vmem:[%s2257_s25 + $0x18] sm:$0xff] %v774_v61 }
 0x102   : > { %787 = vst [vmem:[%s2257_s25 + $0x20] sm:$0xff] %v775_v63 }
 0x105   : > { %v662_v0 = vpop.f32.mrf.mxu2 }
 0x106   : > { %v686_v1 = vpop.f32.mrf.mxu3  ;;  %v616_v2 = vpop.f32.mrf.mxu0 }
 0x107   : > { %v776_v3 = vpack.c.bf16 %v686_v1, %v662_v0  ;;  %v640_v4 = vpop.f32.mrf.mxu1 }
 0x108   : > { %v777_v5 = vpack.c.bf16 %v640_v4, %v616_v2 }
 0x109   : > { %788 = vst [vmem:[%s2257_s25 + $0x28] sm:$0xff] %v776_v3 }
 0x10a   : > { %789 = vst [vmem:[%s2257_s25 + $0x30] sm:$0xff] %v777_v5 }
 0x10d   : > { %v664_v6 = vpop.f32.mrf.mxu2 }
 0x10e   : > { %v688_v7 = vpop.f32.mrf.mxu3  ;;  %v619_v8 = vpop.f32.mrf.mxu0 }
 0x10f   : > { %v778_v9 = vpack.c.bf16 %v688_v7, %v664_v6  ;;  %v643_v10 = vpop.f32.mrf.mxu1 }
 0x110   : > { %v779_v11 = vpack.c.bf16 %v643_v10, %v619_v8 }
 0x111   : > { %790 = vst [vmem:[%s2257_s25 + $0x38] sm:$0xff] %v778_v9 }
 0x112   : > { %791 = vst [vmem:[%s2257_s25 + $0x40] sm:$0xff] %v779_v11 }
 0x115   : > { %v667_v12 = vpop.f32.mrf.mxu2 }
 0x116   : > { %v691_v13 = vpop.f32.mrf.mxu3  ;;  %v621_v14 = vpop.f32.mrf.mxu0 }
 0x117   : > { %v780_v15 = vpack.c.bf16 %v691_v13, %v667_v12  ;;  %v645_v16 = vpop.f32.mrf.mxu1 }
 0x118   : > { %v781_v17 = vpack.c.bf16 %v645_v16, %v621_v14 }
 0x119   : > { %792 = vst [vmem:[%s2257_s25 + $0x48] sm:$0xff] %v780_v15 }
 0x11a   : > { %793 = vst [vmem:[%s2257_s25 + $0x50] sm:$0xff] %v781_v17 }
 0x11d   : > { %v669_v18 = vpop.f32.mrf.mxu2  ;;  %801 = sbr.rel (!%p2108_p6) target bundleno = 462 (0x1ce), region = 106 }
 0x11e   : > { %v693_v19 = vpop.f32.mrf.mxu3 }
 0x11f   : > { %v782_v20 = vpack.c.bf16 %v693_v19, %v669_v18 }
 0x121   : > { %794 = vst [vmem:[%s2257_s25 + $0x58] sm:$0xff] %v782_v20 }
 0x122   : > { %s2614_s3 = smov (!%p805_p10, %s804_s3), 4 }
 0x123   : > { %s807_s28 = smul.u32 24, %s2614_s3  ;;  %s2280_s27 = sshll.u32 %s2614_s3, 2 }
 0x125   : > { %p1450_p11 = scmp.eq.s32.totalorder %s807_s28, 0 }
 0x126   : > { %p817_p12 = scmp.lt.u32.totalorder (!%p1450_p11), %s2280_s27, 8 }
 0x127   : > { %816 = sbr.rel (%p1450_p11) target bundleno = 462 (0x1ce), region = 110 }
 0x12c   : > { %820 = sbr.rel (%p817_p12) target bundleno = 448 (0x1c0), region = 114  ;;  %s2284_s18 = sand.u32 (!%p817_p12), 7, %s2280_s27  }
 0x12d   : > { %p847_p6 = scmp.eq.s32.totalorder (!%p817_p12), %s2284_s18, 0  ;;  %p1451_p13 = scmp.ne.s32.totalorder (!%p817_p12), %s2284_s18, 0 }
 0x131   : > { %850 = sbr.rel (%p1451_p13) target bundleno = 371 (0x173), region = 129  ;;  %s851_s11 = sshrl.u32 (!%p1451_p13), %s2280_s27, 3 }
 0x132   : > { %1778 = sdivrem.u32 (!%p1451_p13), %s851_s11, 6 }
 0x13b   : > { %s2291_s30 = spop.drf %1778 }
 0x13c   : > { %s1780_s6 = spop.drf %1778  ;;  %p1452_p0 = scmp.le.s32.totalorder %s2291_s30, 0 }
 0x13d   : > { %s2585_s7 = smov (!%p1452_p0), %s2278_s26  ;;  %s2586_s8 = smov (!%p1452_p0), %s2257_s25 }
 0x13e   : > { %1306 = sbr.rel (%p1452_p0) target bundleno = 345 (0x159), region = 280  ;;  %s2300_s15 = smov (!%p1452_p0), 0  }
 0x13f   : > { %s2302_s16 = smov (!%p1452_p0), 0  }
 0x143 LB: >> { %v863_v21 = vld [vmem:[%s1996_s8] sm:$0xff]  ;;  %v865_v22 = vld [vmem:[%s1996_s8 + $0x8] sm:$0xff]  ;;  %v867_v23 = vld [vmem:[%s1996_s8 + $0x10] sm:$0xff]  ;;  %s935_s17 = sadd.s32 1, %s2000_s15  ;;  %s857_s16 = sadd.s32 1, %s2004_s16   ;;  %s2004_s16 = sphi %s2302_s16, %s857_s16   ;;  %s2000_s15 = sphi %s2300_s15, %s2589_s15   ;;  %s1996_s8 = sphi %s2586_s8, %s2588_s8   ;;  %s1992_s7 = sphi %s2585_s7, %s2587_s7  }
 0x144   : >> { %864 = vst [vmem:[%s1992_s7] sm:$0xff] %v863_v21  ;;  %v877_v24 = vld [vmem:[%s1996_s8 + $0x18] sm:$0xff]  ;;  %v879_v25 = vld [vmem:[%s1996_s8 + $0x20] sm:$0xff]  ;;  %p936_p1 = scmp.ge.s32.totalorder %s935_s17, %s2291_s30  ;;  %v889_v26 = vld [vmem:[%s1996_s8 + $0x28] sm:$0xff]  ;;  %p856_p2 = scmp.ge.s32.totalorder %s857_s16, %s2291_s30 }
 0x145   : >> { %866 = vst [vmem:[%s1992_s7 + $0x8] sm:$0xff] %v865_v22  ;;  %v891_v27 = vld [vmem:[%s1996_s8 + $0x30] sm:$0xff]  ;;  %v901_v28 = vld [vmem:[%s1996_s8 + $0x38] sm:$0xff]  ;;  %v903_v29 = vld [vmem:[%s1996_s8 + $0x40] sm:$0xff] }
 0x146   : >> { %868 = vst [vmem:[%s1992_s7 + $0x10] sm:$0xff] %v867_v23  ;;  %s2616_s17 = smov (%p936_p1, %s935_s17), 0  ;;  %v913_v30 = vld [vmem:[%s1996_s8 + $0x48] sm:$0xff]  ;;  %v915_v31 = vld [vmem:[%s1996_s8 + $0x50] sm:$0xff]  ;;  %v925_v32 = vld [vmem:[%s1996_s8 + $0x58] sm:$0xff] }
 0x147   : >> { %876 = vst [vmem:[%s1992_s7 + $0x18] sm:$0xff] %v867_v23  ;;  %s938_s20 = smul.u32 48, %s2616_s17  ;;  %v927_v33 = vld [vmem:[%s1996_s8 + $0x60] sm:$0xff]  ;;  %v929_v34 = vld [vmem:[%s1996_s8 + $0x68] sm:$0xff]  ;;  %v931_v35 = vld [vmem:[%s1996_s8 + $0x70] sm:$0xff]  ;;  %s2589_s15 = smov %s2616_s17 }
 0x148   : >> { %878 = vst [vmem:[%s1992_s7 + $0x20] sm:$0xff] %v877_v24  ;;  %v933_v36 = vld [vmem:[%s1996_s8 + $0x78] sm:$0xff] }
 0x149   : >> { %880 = vst [vmem:[%s1992_s7 + $0x28] sm:$0xff] %v879_v25  ;;  %s940_s21 = scalar_lea.vmem %s2257_s25, %s938_s20 [#allocation4]   ;;  %s941_s22 = scalar_lea.vmem %s2278_s26, %s938_s20  }
 0x14a   : >> { %888 = vst [vmem:[%s1992_s7 + $0x30] sm:$0xff] %v879_v25  ;;  %s2588_s8 = smov %s940_s21 }
 0x14b   : >> { %890 = vst [vmem:[%s1992_s7 + $0x38] sm:$0xff] %v889_v26 }
 0x14c   : >> { %892 = vst [vmem:[%s1992_s7 + $0x40] sm:$0xff] %v891_v27 }
 0x14d   : >> { %900 = vst [vmem:[%s1992_s7 + $0x48] sm:$0xff] %v891_v27 }
 0x14e   : >> { %902 = vst [vmem:[%s1992_s7 + $0x50] sm:$0xff] %v901_v28 }
 0x14f   : >> { %904 = vst [vmem:[%s1992_s7 + $0x58] sm:$0xff] %v903_v29 }
 0x150   : >> { %912 = vst [vmem:[%s1992_s7 + $0x60] sm:$0xff] %v903_v29 }
 0x151   : >> { %914 = vst [vmem:[%s1992_s7 + $0x68] sm:$0xff] %v913_v30 }
 0x152   : >> { %916 = vst [vmem:[%s1992_s7 + $0x70] sm:$0xff] %v915_v31 }
 0x153   : >> { %924 = vst [vmem:[%s1992_s7 + $0x78] sm:$0xff] %v915_v31 }
 0x154   : >> { %926 = vst [vmem:[%s1992_s7 + $0x80] sm:$0xff] %v925_v32  ;;  %859 = sbr.rel (!%p856_p2) target bundleno = 323 (0x143), region = 286 }
 0x155   : >> { %928 = vst [vmem:[%s1992_s7 + $0x88] sm:$0xff] %v927_v33 }
 0x156   : >> { %930 = vst [vmem:[%s1992_s7 + $0x90] sm:$0xff] %v929_v34 }
 0x157   : >> { %932 = vst [vmem:[%s1992_s7 + $0x98] sm:$0xff] %v931_v35 }
 0x158   : >> { %934 = vst [vmem:[%s1992_s7 + $0xa0] sm:$0xff] %v933_v36  ;;  %s2587_s7 = smov %s941_s22 }
 0x159 PF: > { %1781 = sdivrem.u32 %s851_s11, 6 }
 0x15a   : > { %s1453_s23 = smul.u32 48, %s2291_s30 }
 0x15c   : > { %s2372_s24 = scalar_lea.vmem %s2257_s25, %s1453_s23 [#allocation4]   ;;  %s2375_s9 = scalar_lea.vmem %s2278_s26, %s1453_s23  }
 0x162   : > { %s1782_s4 = spop.drf %1781 }
 0x163   : > { %s2377_s3 = spop.drf %1781 }
 0x164   : > { %p1455_p3 = scmp.le.s32.totalorder %s2377_s3, 0 }
 0x165   : > { %s2590_s5 = smov (!%p1455_p3), %s2375_s9  ;;  %s2591_s29 = smov (!%p1455_p3), %s2372_s24 }
 0x166   : > { %1320 = sbr.rel (%p1455_p3) target bundleno = 371 (0x173), region = 291  ;;  %s2386_s28 = smov (!%p1455_p3), 0  }
 0x167   : > { %s2388_s11 = smov (!%p1455_p3), 0  }
 0x16b LB: >> { %v958_v37 = vld [vmem:[%s2012_s29] sm:$0xff]  ;;  %v960_v38 = vld [vmem:[%s2012_s29 + $0x10] sm:$0xff]  ;;  %s970_s30 = sadd.s32 1, %s2016_s28  ;;  %s952_s11 = sadd.s32 1, %s2020_s11   ;;  %s2020_s11 = sphi %s2388_s11, %s952_s11   ;;  %s2016_s28 = sphi %s2386_s28, %s2592_s28   ;;  %s2012_s29 = sphi %s2591_s29, %s975_s29   ;;  %s2008_s5 = sphi %s2590_s5, %s976_s5  }
 0x16c   : >> { %v962_v39 = vld [vmem:[%s2012_s29 + $0x20] sm:$0xff]  ;;  %959 = vst [vmem:[%s2008_s5] sm:$0xff] %v958_v37  ;;  %v964_v40 = vld [vmem:[%s2012_s29 + $0x30] sm:$0xff]  ;;  %p971_p4 = scmp.ge.s32.totalorder %s970_s30, %s2377_s3  ;;  %p951_p5 = scmp.ge.s32.totalorder %s952_s11, %s2377_s3 }
 0x16d   : >> { %961 = vst [vmem:[%s2008_s5 + $0x18] sm:$0xff] %v960_v38  ;;  %v966_v41 = vld [vmem:[%s2012_s29 + $0x40] sm:$0xff]  ;;  %v968_v42 = vld [vmem:[%s2012_s29 + $0x50] sm:$0xff] }
 0x16e   : >> { %963 = vst [vmem:[%s2008_s5 + $0x30] sm:$0xff] %v962_v39  ;;  %s2618_s30 = smov (%p971_p4, %s970_s30), 0  ;;  %954 = sbr.rel (!%p951_p5) target bundleno = 363 (0x16b), region = 297 }
 0x16f   : >> { %965 = vst [vmem:[%s2008_s5 + $0x48] sm:$0xff] %v964_v40  ;;  %s1456_s6 = sshll.u32 %s2618_s30, 3  ;;  %s2592_s28 = smov %s2618_s30 }
 0x170   : >> { %967 = vst [vmem:[%s2008_s5 + $0x60] sm:$0xff] %v966_v41  ;;  %s975_s29 = scalar_lea.vmem %s2372_s24, %s1456_s6 [#allocation4]  }
 0x171   : >> { %969 = vst [vmem:[%s2008_s5 + $0x78] sm:$0xff] %v968_v42  ;;  %s976_s5 = scalar_lea.vmem %s2375_s9, %s1456_s6  }
 0x173 PF: > { %979 = sbr.rel (%p847_p6) target bundleno = 448 (0x1c0), region = 147  ;;  %s981_s7 = ssub.s32 (!%p847_p6), %s2280_s27, %s2284_s18 }
 0x174   : > { %s985_s8 = sshrl.u32 (!%p847_p6), %s2280_s27, 3  ;;  %s2412_s15 = scalar_lea.vmem (!%p847_p6), %s2257_s25, %s981_s7 [#allocation4] }
 0x175   : > { %s2415_s16 = scalar_lea.vmem (!%p847_p6), %s2278_s26, %s981_s7  ;;  %1784 = sdivrem.u32 (!%p847_p6), %s985_s8, 6 }
 0x17e   : > { %s2419_s17 = spop.drf %1784 }
 0x17f   : > { %s1786_s20 = spop.drf %1784  ;;  %p1458_p7 = scmp.le.s32.totalorder %s2419_s17, 0 }
 0x180   : > { %s2593_s21 = smov (!%p1458_p7), %s2278_s26  ;;  %s2594_s22 = smov (!%p1458_p7), %s2257_s25 }
 0x181   : > { %1334 = sbr.rel (%p1458_p7) target bundleno = 412 (0x19c), region = 302  ;;  %s2428_s23 = smov (!%p1458_p7), 0  }
 0x182   : > { %s2430_s24 = smov (!%p1458_p7), 0  }
 0x186 LB: >> { %v997_v43 = vld [vmem:[%s2028_s22] sm:$0xff]  ;;  %v999_v44 = vld [vmem:[%s2028_s22 + $0x8] sm:$0xff]  ;;  %v1001_v45 = vld [vmem:[%s2028_s22 + $0x10] sm:$0xff]  ;;  %s1069_s9 = sadd.s32 1, %s2032_s23  ;;  %s991_s24 = sadd.s32 1, %s2036_s24   ;;  %s2036_s24 = sphi %s2430_s24, %s991_s24   ;;  %s2032_s23 = sphi %s2428_s23, %s2597_s23   ;;  %s2028_s22 = sphi %s2594_s22, %s2596_s22   ;;  %s2024_s21 = sphi %s2593_s21, %s2595_s21  }
 0x187   : >> { %998 = vst [vmem:[%s2024_s21] sm:$0xff] %v997_v43  ;;  %v1011_v46 = vld [vmem:[%s2028_s22 + $0x18] sm:$0xff]  ;;  %v1013_v47 = vld [vmem:[%s2028_s22 + $0x20] sm:$0xff]  ;;  %p1070_p8 = scmp.ge.s32.totalorder %s1069_s9, %s2419_s17  ;;  %v1023_v48 = vld [vmem:[%s2028_s22 + $0x28] sm:$0xff]  ;;  %p990_p9 = scmp.ge.s32.totalorder %s991_s24, %s2419_s17 }
 0x188   : >> { %1000 = vst [vmem:[%s2024_s21 + $0x8] sm:$0xff] %v999_v44  ;;  %v1025_v49 = vld [vmem:[%s2028_s22 + $0x30] sm:$0xff]  ;;  %v1035_v50 = vld [vmem:[%s2028_s22 + $0x38] sm:$0xff]  ;;  %v1037_v51 = vld [vmem:[%s2028_s22 + $0x40] sm:$0xff] }
 0x189   : >> { %1002 = vst [vmem:[%s2024_s21 + $0x10] sm:$0xff] %v1001_v45  ;;  %s2620_s9 = smov (%p1070_p8, %s1069_s9), 0  ;;  %v1047_v52 = vld [vmem:[%s2028_s22 + $0x48] sm:$0xff]  ;;  %v1049_v53 = vld [vmem:[%s2028_s22 + $0x50] sm:$0xff]  ;;  %v1059_v54 = vld [vmem:[%s2028_s22 + $0x58] sm:$0xff] }
 0x18a   : >> { %1010 = vst [vmem:[%s2024_s21 + $0x18] sm:$0xff] %v1001_v45  ;;  %s1072_s4 = smul.u32 48, %s2620_s9  ;;  %v1061_v55 = vld [vmem:[%s2028_s22 + $0x60] sm:$0xff]  ;;  %v1063_v56 = vld [vmem:[%s2028_s22 + $0x68] sm:$0xff]  ;;  %v1065_v57 = vld [vmem:[%s2028_s22 + $0x70] sm:$0xff]  ;;  %s2597_s23 = smov %s2620_s9 }
 0x18b   : >> { %1012 = vst [vmem:[%s2024_s21 + $0x20] sm:$0xff] %v1011_v46  ;;  %v1067_v58 = vld [vmem:[%s2028_s22 + $0x78] sm:$0xff] }
 0x18c   : >> { %1014 = vst [vmem:[%s2024_s21 + $0x28] sm:$0xff] %v1013_v47  ;;  %s1074_s3 = scalar_lea.vmem %s2257_s25, %s1072_s4 [#allocation4]   ;;  %s1075_s5 = scalar_lea.vmem %s2278_s26, %s1072_s4  }
 0x18d   : >> { %1022 = vst [vmem:[%s2024_s21 + $0x30] sm:$0xff] %v1013_v47  ;;  %s2596_s22 = smov %s1074_s3 }
 0x18e   : >> { %1024 = vst [vmem:[%s2024_s21 + $0x38] sm:$0xff] %v1023_v48 }
 0x18f   : >> { %1026 = vst [vmem:[%s2024_s21 + $0x40] sm:$0xff] %v1025_v49 }
 0x190   : >> { %1034 = vst [vmem:[%s2024_s21 + $0x48] sm:$0xff] %v1025_v49 }
 0x191   : >> { %1036 = vst [vmem:[%s2024_s21 + $0x50] sm:$0xff] %v1035_v50 }
 0x192   : >> { %1038 = vst [vmem:[%s2024_s21 + $0x58] sm:$0xff] %v1037_v51 }
 0x193   : >> { %1046 = vst [vmem:[%s2024_s21 + $0x60] sm:$0xff] %v1037_v51 }
 0x194   : >> { %1048 = vst [vmem:[%s2024_s21 + $0x68] sm:$0xff] %v1047_v52 }
 0x195   : >> { %1050 = vst [vmem:[%s2024_s21 + $0x70] sm:$0xff] %v1049_v53 }
 0x196   : >> { %1058 = vst [vmem:[%s2024_s21 + $0x78] sm:$0xff] %v1049_v53 }
 0x197   : >> { %1060 = vst [vmem:[%s2024_s21 + $0x80] sm:$0xff] %v1059_v54  ;;  %993 = sbr.rel (!%p990_p9) target bundleno = 390 (0x186), region = 308 }
 0x198   : >> { %1062 = vst [vmem:[%s2024_s21 + $0x88] sm:$0xff] %v1061_v55 }
 0x199   : >> { %1064 = vst [vmem:[%s2024_s21 + $0x90] sm:$0xff] %v1063_v56 }
 0x19a   : >> { %1066 = vst [vmem:[%s2024_s21 + $0x98] sm:$0xff] %v1065_v57 }
 0x19b   : >> { %1068 = vst [vmem:[%s2024_s21 + $0xa0] sm:$0xff] %v1067_v58  ;;  %s2595_s21 = smov %s1075_s5 }
 0x19c PF: > { %1787 = sdivrem.u32 %s985_s8, 6 }
 0x19d   : > { %s1459_s29 = smul.u32 48, %s2419_s17 }
 0x19f   : > { %s2500_s28 = scalar_lea.vmem %s2257_s25, %s1459_s29 [#allocation4]   ;;  %s2503_s11 = scalar_lea.vmem %s2278_s26, %s1459_s29  }
 0x1a5   : > { %s1788_s30 = spop.drf %1787 }
 0x1a6   : > { %s2505_s6 = spop.drf %1787 }
 0x1a7   : > { %p1461_p10 = scmp.le.s32.totalorder %s2505_s6, 0 }
 0x1a8   : > { %s2598_s7 = smov (!%p1461_p10), %s2503_s11  ;;  %s2599_s20 = smov (!%p1461_p10), %s2500_s28 }
 0x1a9   : > { %1348 = sbr.rel (%p1461_p10) target bundleno = 438 (0x1b6), region = 313  ;;  %s2514_s21 = smov (!%p1461_p10), 0  }
 0x1aa   : > { %s2516_s8 = smov (!%p1461_p10), 0  }
 0x1ae LB: >> { %v1092_v59 = vld [vmem:[%s2044_s20] sm:$0xff]  ;;  %v1094_v60 = vld [vmem:[%s2044_s20 + $0x10] sm:$0xff]  ;;  %s1104_s17 = sadd.s32 1, %s2048_s21  ;;  %s1086_s8 = sadd.s32 1, %s2052_s8   ;;  %s2052_s8 = sphi %s2516_s8, %s1086_s8   ;;  %s2048_s21 = sphi %s2514_s21, %s2600_s21   ;;  %s2044_s20 = sphi %s2599_s20, %s1109_s20   ;;  %s2040_s7 = sphi %s2598_s7, %s1110_s7  }
 0x1af   : >> { %v1096_v61 = vld [vmem:[%s2044_s20 + $0x20] sm:$0xff]  ;;  %1093 = vst [vmem:[%s2040_s7] sm:$0xff] %v1092_v59  ;;  %v1098_v62 = vld [vmem:[%s2044_s20 + $0x30] sm:$0xff]  ;;  %p1105_p11 = scmp.ge.s32.totalorder %s1104_s17, %s2505_s6  ;;  %p1085_p12 = scmp.ge.s32.totalorder %s1086_s8, %s2505_s6 }
 0x1b0   : >> { %1095 = vst [vmem:[%s2040_s7 + $0x18] sm:$0xff] %v1094_v60  ;;  %v1100_v63 = vld [vmem:[%s2044_s20 + $0x40] sm:$0xff]  ;;  %v1102_v0 = vld [vmem:[%s2044_s20 + $0x50] sm:$0xff] }
 0x1b1   : >> { %1097 = vst [vmem:[%s2040_s7 + $0x30] sm:$0xff] %v1096_v61  ;;  %s2622_s17 = smov (%p1105_p11, %s1104_s17), 0  ;;  %1088 = sbr.rel (!%p1085_p12) target bundleno = 430 (0x1ae), region = 319 }
 0x1b2   : >> { %1099 = vst [vmem:[%s2040_s7 + $0x48] sm:$0xff] %v1098_v62  ;;  %s1462_s22 = sshll.u32 %s2622_s17, 3  ;;  %s2600_s21 = smov %s2622_s17 }
 0x1b3   : >> { %1101 = vst [vmem:[%s2040_s7 + $0x60] sm:$0xff] %v1100_v63  ;;  %s1109_s20 = scalar_lea.vmem %s2500_s28, %s1462_s22 [#allocation4]  }
 0x1b4   : >> { %1103 = vst [vmem:[%s2040_s7 + $0x78] sm:$0xff] %v1102_v0  ;;  %s1110_s7 = scalar_lea.vmem %s2503_s11, %s1462_s22  }
 0x1b6 PF: > { %s2056_s23 = smov 1  }
 0x1b7   : > { %s1111_s24 = sshll.u32 %s2056_s23, %s2284_s18 }
 0x1b8   : > { %s1464_s9 = sadd.s32 4294967295, %s1111_s24 }
 0x1b9   : > { %v1121_v1 = vld [vmem:[%s2412_s15] sm:%s1464_s9]  ;;  %v1123_v2 = vld [vmem:[%s2412_s15 + $0x10] sm:%s1464_s9] }
 0x1ba   : > { %1122 = vst [vmem:[%s2415_s16] sm:%s1464_s9] %v1121_v1  ;;  %v1125_v3 = vld [vmem:[%s2412_s15 + $0x20] sm:%s1464_s9] }
 0x1bb   : > { %1124 = vst [vmem:[%s2415_s16 + $0x18] sm:%s1464_s9] %v1123_v2  ;;  %v1127_v4 = vld [vmem:[%s2412_s15 + $0x30] sm:%s1464_s9] }
 0x1bc   : > { %1126 = vst [vmem:[%s2415_s16 + $0x30] sm:%s1464_s9] %v1125_v3  ;;  %v1129_v5 = vld [vmem:[%s2412_s15 + $0x40] sm:%s1464_s9] }
 0x1bd   : > { %1128 = vst [vmem:[%s2415_s16 + $0x48] sm:%s1464_s9] %v1127_v4  ;;  %v1131_v6 = vld [vmem:[%s2412_s15 + $0x50] sm:%s1464_s9] }
 0x1be   : > { %1130 = vst [vmem:[%s2415_s16 + $0x60] sm:%s1464_s9] %v1129_v5 }
 0x1bf   : > { %1132 = vst [vmem:[%s2415_s16 + $0x78] sm:%s1464_s9] %v1131_v6 }
 0x1c0 PF: > { %p1465_p6 = scmp.ge.u32.totalorder %s2280_s27, 8 }
 0x1c1   : > { %s2057_s4 = smov (!%p1465_p6), 1  }
 0x1c2   : > { %823 = sbr.rel (%p1465_p6) target bundleno = 462 (0x1ce), region = 118  ;;  %s824_s18 = sshll.u32 (!%p1465_p6), %s2057_s4, %s2280_s27 }
 0x1c3   : > { %s1466_s15 = sadd.s32 (!%p1465_p6), 4294967295, %s824_s18 }
 0x1c7   : > { %v834_v7 = vld [vmem:[%s2257_s25] sm:%s1466_s15]  ;;  %v836_v8 = vld [vmem:[%s2257_s25 + $0x10] sm:%s1466_s15] }
 0x1c8   : > { %835 = vst [vmem:[%s2278_s26] sm:%s1466_s15] %v834_v7  ;;  %v838_v9 = vld [vmem:[%s2257_s25 + $0x20] sm:%s1466_s15] }
 0x1c9   : > { %837 = vst [vmem:[%s2278_s26 + $0x18] sm:%s1466_s15] %v836_v8  ;;  %v840_v10 = vld [vmem:[%s2257_s25 + $0x30] sm:%s1466_s15] }
 0x1ca   : > { %839 = vst [vmem:[%s2278_s26 + $0x30] sm:%s1466_s15] %v838_v9  ;;  %v842_v11 = vld [vmem:[%s2257_s25 + $0x40] sm:%s1466_s15] }
 0x1cb   : > { %841 = vst [vmem:[%s2278_s26 + $0x48] sm:%s1466_s15] %v840_v10  ;;  %v844_v12 = vld [vmem:[%s2257_s25 + $0x50] sm:%s1466_s15] }
 0x1cc   : > { %843 = vst [vmem:[%s2278_s26 + $0x60] sm:%s1466_s15] %v842_v11 }
 0x1cd   : > { %845 = vst [vmem:[%s2278_s26 + $0x78] sm:%s1466_s15] %v844_v12 }
 0x1ce PF: > { %s12_s13 = sadd.s32 1, %s1956_s13   ;;  %s2601_s9 = smov %s1944_s10 }
 0x1cf   : > { %p9_p13 = scmp.ge.s32.totalorder %s12_s13, 4   ;;  %s2602_s10 = smov %s2113_s19 }
 0x1d0   : > { %s2603_s11 = smov %s1952_s12  ;;  %s2604_s12 = smov %s2606_s14 }
 0x1d1   :  { %11 = sbr.rel (!%p9_p13) target bundleno = 3 (0x3), region = 330 }

// kernel: sparse_axial_causal_attention.5
= control target key start
LH: loop header
LB: loop body
LE: loop exit
PB: predicated region body
PF: predicated region fallthrough
CT: control target
= control target key end

     0   :  { %vm18_vm0 = vcmask 261120   ;;  %v413_v34 = vmov 0.0   ;;  %s557_s1 = inlined_call_operand.vmem [shape: bf16[256,32], index: 1, kind: input, shape index: {}]   ;;  %s558_s0 = inlined_call_operand.vmem [shape: bf16[48,256], index: 0, kind: input, shape index: {}]   ;;  %s559_s2 = inlined_call_operand.vmem [shape: f32[1,32], index: 2, kind: input, shape index: {}]   ;;  %s560_s3 = inlined_call_operand.vmem [shape: f32[48,32], index: 3, kind: output, shape index: {}]  }
   0x1   :  { %v386_v0 = vld [vmem:[%s557_s1 + $0x38] sm:$0xff]  ;;  %v385_v2 = vld [vmem:[%s557_s1 + $0x30] sm:$0xff]  ;;  %v384_v4 = vld [vmem:[%s557_s1 + $0x28] sm:$0xff]  ;;  %21 = vst.msk [vmem:[#allocation2 + $0x10] sm:$0xff] %vm18_vm0, %v413_v34 }
   0x2   :  { %v394_v1 = vld [vmem:[%s557_s1 + $0x78] sm:$0xff]  ;;  %395 = vmatpush.bf16.msra.mxu2 %v386_v0  ;;  %v393_v3 = vld [vmem:[%s557_s1 + $0x70] sm:$0xff]  ;;  %195 = vmatpush.bf16.msra.mxu0 %v386_v0  ;;  %v392_v5 = vld [vmem:[%s557_s1 + $0x68] sm:$0xff]  ;;  %19 = vst.msk [vmem:[#allocation2] sm:$0xff] %vm18_vm0, %v413_v34 }
   0x3   :  { %403 = vmatpush.bf16.msra.mxu3 %v394_v1  ;;  %219 = vmatpush.bf16.msra.mxu1 %v394_v1  ;;  %v383_v6 = vld [vmem:[%s557_s1 + $0x20] sm:$0xff]  ;;  %v382_v8 = vld [vmem:[%s557_s1 + $0x18] sm:$0xff]  ;;  %v381_v10 = vld [vmem:[%s557_s1 + $0x10] sm:$0xff]  ;;  %20 = vst.msk [vmem:[#allocation2 + $0x8] sm:$0xff] %vm18_vm0, %v413_v34 }
   0x4   :  { %v391_v7 = vld [vmem:[%s557_s1 + $0x60] sm:$0xff]  ;;  %v390_v9 = vld [vmem:[%s557_s1 + $0x58] sm:$0xff]  ;;  %v389_v11 = vld [vmem:[%s557_s1 + $0x50] sm:$0xff]  ;;  %22 = vst.msk [vmem:[#allocation2 + $0x18] sm:$0xff] %vm18_vm0, %v413_v34 }
   0x5   :  { %v380_v12 = vld [vmem:[%s557_s1 + $0x8] sm:$0xff]  ;;  %v379_v14 = vld [vmem:[%s557_s1] sm:$0xff]  ;;  %v295_v16 = vld [vmem:[%s558_s0 + $0x10] sm:$0xf]  ;;  %23 = vst.msk [vmem:[#allocation2 + $0x20] sm:$0xff] %vm18_vm0, %v413_v34 }
   0x6   :  { %396 = vmatpush.bf16.msra.mxu2 %v385_v2  ;;  %196 = vmatpush.bf16.msra.mxu0 %v385_v2  ;;  %v388_v13 = vld [vmem:[%s557_s1 + $0x48] sm:$0xff]  ;;  %v387_v15 = vld [vmem:[%s557_s1 + $0x40] sm:$0xff]  ;;  %v376_v17 = vld [vmem:[%s558_s0 + $0x14] sm:$0xf0]  ;;  %24 = vst.msk [vmem:[#allocation2 + $0x28] sm:$0xff] %vm18_vm0, %v413_v34 }
   0x7   :  { %404 = vmatpush.bf16.msra.mxu3 %v393_v3  ;;  %220 = vmatpush.bf16.msra.mxu1 %v393_v3  ;;  %v375_v18 = vld [vmem:[%s558_s0 + $0x14] sm:$0xf]  ;;  %v297_v19 = vld [vmem:[%s558_s0 + $0x18] sm:$0xf0]  ;;  %v287_v20 = vld [vmem:[%s558_s0] sm:$0xf]  ;;  %v296_v24 = vor.u32 %v376_v17, %v295_v16 }
   0x8   :  { %v374_v21 = vld [vmem:[%s558_s0 + $0x4] sm:$0xf0]  ;;  %v373_v22 = vld [vmem:[%s558_s0 + $0x4] sm:$0xf]  ;;  %v289_v23 = vld [vmem:[%s558_s0 + $0x8] sm:$0xf0]  ;;  %v300_v25 = vor.u32 %v375_v18, %v297_v19 }
   0x9   :  { %v288_v26 = vor.u32 %v374_v21, %v287_v20  ;;  %v292_v27 = vor.u32 %v373_v22, %v289_v23  ;;  %v303_v28 = vld [vmem:[%s558_s0 + $0x20] sm:$0xf]  ;;  %v378_v29 = vld [vmem:[%s558_s0 + $0x24] sm:$0xf0]  ;;  %v377_v30 = vld [vmem:[%s558_s0 + $0x24] sm:$0xf] }
   0xa   :  { %397 = vmatpush.bf16.msra.mxu2 %v384_v4  ;;  %197 = vmatpush.bf16.msra.mxu0 %v384_v4  ;;  %v305_v31 = vld [vmem:[%s558_s0 + $0x28] sm:$0xf0]  ;;  %v304_v32 = vor.u32 %v378_v29, %v303_v28  ;;  %v63_v36 = vld [vmem:[#allocation2] sm:$0xff]  ;;  %v65_v41 = vld [vmem:[#allocation2 + $0x10] sm:$0xff] }
   0xb   :  { %405 = vmatpush.bf16.msra.mxu3 %v392_v5  ;;  %221 = vmatpush.bf16.msra.mxu1 %v392_v5  ;;  %v308_v33 = vor.u32 %v377_v30, %v305_v31  ;;  %v64_v46 = vld [vmem:[#allocation2 + $0x8] sm:$0xff]  ;;  %v412_v49 = vld [vmem:[%s559_s2] ss:$0 sm:$0xff]  ;;  %v66_v54 = vld [vmem:[#allocation2 + $0x18] sm:$0xff] }
   0xc   :  { %v67_v63 = vld [vmem:[#allocation2 + $0x20] sm:$0xff] }
   0xe   :  { %398 = vmatpush.bf16.msra.mxu2 %v383_v6  ;;  %198 = vmatpush.bf16.msra.mxu0 %v383_v6  ;;  %v68_v6 = vld [vmem:[#allocation2 + $0x28] sm:$0xff] }
   0xf   :  { %406 = vmatpush.bf16.msra.mxu3 %v391_v7  ;;  %222 = vmatpush.bf16.msra.mxu1 %v391_v7 }
  0x12   :  { %399 = vmatpush.bf16.msra.mxu2 %v382_v8  ;;  %199 = vmatpush.bf16.msra.mxu0 %v382_v8 }
  0x13   :  { %407 = vmatpush.bf16.msra.mxu3 %v390_v9  ;;  %223 = vmatpush.bf16.msra.mxu1 %v390_v9 }
  0x16   :  { %400 = vmatpush.bf16.msra.mxu2 %v381_v10  ;;  %200 = vmatpush.bf16.msra.mxu0 %v381_v10 }
  0x17   :  { %408 = vmatpush.bf16.msra.mxu3 %v389_v11  ;;  %224 = vmatpush.bf16.msra.mxu1 %v389_v11 }
  0x1a   :  { %401 = vmatpush.bf16.msra.mxu2 %v380_v12  ;;  %201 = vmatpush.bf16.msra.mxu0 %v380_v12 }
  0x1b   :  { %409 = vmatpush.bf16.msra.mxu3 %v388_v13  ;;  %225 = vmatpush.bf16.msra.mxu1 %v388_v13 }
  0x1e   :  { %402 = vmatpush.bf16.msra.mxu2 %v379_v14  ;;  %202 = vmatpush.bf16.msra.mxu0 %v379_v14 }
  0x1f   :  { %410 = vmatpush.bf16.msra.mxu3 %v387_v15  ;;  %226 = vmatpush.bf16.msra.mxu1 %v387_v15 }
  0x21   :  { %208 = vmatmul.bf16.vlgmr.msra.gmra.mxu2 %v296_v24  ;;  %203 = vmatmul.bf16.vlgmr.msra.gmra.mxu0 %v288_v26 }
  0x22   :  { %232 = vmatmul.bf16.vlgmr.msra.gmra.mxu3 %v300_v25  ;;  %227 = vmatmul.bf16.vlgmr.msra.gmra.mxu1 %v292_v27 }
  0x31   :  { %213 = vmatmul.bf16.gmra.mxu2 %v304_v32 }
  0x32   :  { %237 = vmatmul.bf16.gmra.mxu3 %v308_v33 }
  0x9e   :  { %v204_v35 = vpop.f32.mrf.mxu0 }
  0x9f   :  { %v228_v37 = vpop.f32.mrf.mxu1 }
  0xa0   :  { %v229_v38 = vadd.f32 %v228_v37, %v204_v35 }
  0xa2   :  { %v243_v39 = vadd.f32 %v229_v38, %v63_v36 }
  0xa4   :  { %v209_v40 = vpop.f32.mrf.mxu2  ;;  %250 = vst.msk [vmem:[#allocation2] sm:$0xff] %vm18_vm0, %v243_v39 }
  0xa5   :  { %v233_v42 = vpop.f32.mrf.mxu3 }
  0xa6   :  { %v234_v43 = vadd.f32 %v233_v42, %v209_v40  ;;  %v206_v45 = vpop.f32.mrf.mxu0 }
  0xa7   :  { %v230_v47 = vpop.f32.mrf.mxu1 }
  0xa8   :  { %v245_v44 = vadd.f32 %v234_v43, %v65_v41  ;;  %v231_v48 = vadd.f32 %v230_v47, %v206_v45 }
  0xaa   :  { %252 = vst.msk [vmem:[#allocation2 + $0x10] sm:$0xff] %vm18_vm0, %v245_v44  ;;  %v244_v50 = vadd.f32 %v231_v48, %v64_v46 }
  0xab   :  { %v259_v51 = vld [vmem:[#allocation2] sm:$0xff] }
  0xac   :  { %v211_v52 = vpop.f32.mrf.mxu2  ;;  %v269_v53 = vadd.f32 %v412_v49, %v259_v51  ;;  %251 = vst.msk [vmem:[#allocation2 + $0x8] sm:$0xff] %vm18_vm0, %v244_v50 }
  0xad   :  { %v235_v55 = vpop.f32.mrf.mxu3 }
  0xae   :  { %v236_v56 = vadd.f32 %v235_v55, %v211_v52  ;;  %275 = vst.msk [vmem:[%s560_s3] sm:$0xff] %vm18_vm0, %v269_v53 }
  0xb0   :  { %v246_v57 = vadd.f32 %v236_v56, %v66_v54 }
  0xb1   :  { %v261_v58 = vld [vmem:[#allocation2 + $0x10] sm:$0xff] }
  0xb2   :  { %v271_v59 = vadd.f32 %v412_v49, %v261_v58  ;;  %253 = vst.msk [vmem:[#allocation2 + $0x18] sm:$0xff] %vm18_vm0, %v246_v57 }
  0xb3   :  { %v260_v60 = vld [vmem:[#allocation2 + $0x8] sm:$0xff] }
  0xb4   :  { %277 = vst.msk [vmem:[%s560_s3 + $0x10] sm:$0xff] %vm18_vm0, %v271_v59  ;;  %v214_v61 = vpop.f32.mrf.mxu2  ;;  %v270_v62 = vadd.f32 %v412_v49, %v260_v60 }
  0xb5   :  { %v238_v0 = vpop.f32.mrf.mxu3 }
  0xb6   :  { %v239_v1 = vadd.f32 %v238_v0, %v214_v61  ;;  %276 = vst.msk [vmem:[%s560_s3 + $0x8] sm:$0xff] %vm18_vm0, %v270_v62 }
  0xb8   :  { %v247_v2 = vadd.f32 %v239_v1, %v67_v63 }
  0xb9   :  { %v262_v3 = vld [vmem:[#allocation2 + $0x18] sm:$0xff] }
  0xba   :  { %v272_v4 = vadd.f32 %v412_v49, %v262_v3  ;;  %254 = vst.msk [vmem:[#allocation2 + $0x20] sm:$0xff] %vm18_vm0, %v247_v2 }
  0xbc   :  { %278 = vst.msk [vmem:[%s560_s3 + $0x18] sm:$0xff] %vm18_vm0, %v272_v4  ;;  %v216_v5 = vpop.f32.mrf.mxu2 }
  0xbd   :  { %v240_v7 = vpop.f32.mrf.mxu3 }
  0xbe   :  { %v241_v8 = vadd.f32 %v240_v7, %v216_v5 }
  0xc0   :  { %v248_v9 = vadd.f32 %v241_v8, %v68_v6 }
  0xc1   :  { %v263_v10 = vld [vmem:[#allocation2 + $0x20] sm:$0xff] }
  0xc2   :  { %v273_v11 = vadd.f32 %v412_v49, %v263_v10  ;;  %255 = vst.msk [vmem:[#allocation2 + $0x28] sm:$0xff] %vm18_vm0, %v248_v9 }
  0xc4   :  { %279 = vst.msk [vmem:[%s560_s3 + $0x20] sm:$0xff] %vm18_vm0, %v273_v11 }
  0xc9   :  { %v264_v12 = vld [vmem:[#allocation2 + $0x28] sm:$0xff] }
  0xca   :  { %v274_v13 = vadd.f32 %v412_v49, %v264_v12 }
  0xcc   :  { %280 = vst.msk [vmem:[%s560_s3 + $0x28] sm:$0xff] %vm18_vm0, %v274_v13 }

// kernel: sparse_axial_causal_attention.4
= control target key start
LH: loop header
LB: loop body
LE: loop exit
PB: predicated region body
PF: predicated region fallthrough
CT: control target
= control target key end

     0   :  { %s2316_s0 = inlined_call_operand.vmem [shape: bf16[2,24,768], index: 0, kind: input, shape index: {}, may-alias: {0,1,2}]   ;;  %s2317_s1 = inlined_call_operand.vmem [shape: bf16[2,24,768], index: 1, kind: input, shape index: {}, may-alias: {0,1,2}]   ;;  %s2318_s2 = inlined_call_operand.vmem [shape: bf16[2,24,768], index: 2, kind: input, shape index: {}, may-alias: {0,1,2}]   ;;  %s2319_s3 = inlined_call_operand.vmem [shape: bf16[2,24,256], index: 3, kind: output, shape index: {}]  }
   0x1   :  { %2321 = sst [smem:[#allocation7_spill]] %s2319_s3 }
   0x2   :  { %s1811_s12 = smov 0   ;;  %s1813_s13 = smov 0  }
   0x3   :  { %s1815_s14 = smov 0   ;;  %s1817_s15 = smov 0  }
   0x4   :  { %s1819_s16 = smov 0   ;;  %s1821_s17 = smov 0  }
   0x5   :  { %s1823_s18 = smov 0   ;;  %s1825_s19 = smov 0  }
   0x6   :  { %s1827_s20 = smov 0   ;;  %s1829_s21 = smov 0  }
   0x7   :  { %s1831_s22 = smov 0  }
   0x8 LB: > { %s22_s24 = sadd.s32 1, %s1780_s20  ;;  %s25_s25 = sadd.s32 1, %s1784_s21  ;;  %s1788_s22 = sphi %s1831_s22, %s13_s22   ;;  %s1784_s21 = sphi %s1829_s21, %s2341_s21   ;;  %s1780_s20 = sphi %s1827_s20, %s2340_s20   ;;  %s1776_s19 = sphi %s1825_s19, %s2339_s19   ;;  %s1772_s18 = sphi %s1823_s18, %s2338_s18   ;;  %s1768_s17 = sphi %s1821_s17, %s2337_s17   ;;  %s1764_s16 = sphi %s1819_s16, %s2336_s16   ;;  %s1760_s15 = sphi %s1817_s15, %s2335_s15   ;;  %s1756_s14 = sphi %s1815_s14, %s2334_s14   ;;  %s1752_s13 = sphi %s1813_s13, %s2333_s13   ;;  %s1748_s12 = sphi %s1811_s12, %s2332_s12  }
   0x9   : > { %p23_p0 = scmp.ge.s32.totalorder %s22_s24, 2  ;;  %s34_s26 = sadd.s32 1, %s1768_s17 }
   0xa   : > { %p41_p1 = scmp.ne.s32.totalorder %s1768_s17, %s1764_s16  ;;  %p42_p2 = scmp.eq.s32.totalorder %s1788_s22, 0 }
   0xb   : > { %s2343_s24 = smov (%p23_p0, %s22_s24), 0  ;;  %s2345_s25 = smov (!%p23_p0, %s25_s25), %s1784_s21 }
   0xc   : > { %s30_s27 = ssub.s32 %s1780_s20, %s2343_s24  ;;  %p27_p3 = scmp.ge.s32.totalorder %s2345_s25, 2 }
   0xd   : > { %s57_s28 = sadd.s32 2, %s1780_s20  ;;  %p1884_p4 = por %p42_p2, %p41_p1 }
   0xe   : > { %s58_s30 = sadd.s32 2, %s2343_s24  ;;  %s2347_s25 = smov (%p27_p3, %s2345_s25), 0 }
   0xf   : > { %2323 = sst [smem:[#allocation6_spill]] %s2347_s25  ;;  %s60_s4 = ssub.s32 %s57_s28, %s58_s30 }
  0x10   : > { %s64_s5 = sadd.s32 1, %s1760_s15  ;;  %s29_s6 = ssub.s32 %s1784_s21, %s2347_s25 }
  0x11   : > { %p71_p5 = scmp.ne.s32.totalorder %s1760_s15, %s1756_s14  ;;  %s31_s7 = sor.u32 %s30_s27, %s29_s6 }
  0x12   : > { %s61_s8 = sor.u32 %s60_s4, %s29_s6  ;;  %p32_p6 = scmp.eq.s32.totalorder %s31_s7, 0 }
  0x13   : > { %p62_p7 = scmp.eq.s32.totalorder %s61_s8, 0  ;;  %p1898_p8 = por %p71_p5, %p42_p2 }
  0x14   : > { %s87_s10 = sadd.s32 4, %s1780_s20  ;;  %s88_s30 = sadd.s32 4, %s2343_s24 }
  0x15   : > { %s1904_s11 = scalar_select %p32_p6, %s1768_s17, %s34_s26  }
  0x16   : > { %s1907_s28 = scalar_select %p62_p7, %s1760_s15, %s64_s5  }
  0x17   : > { %s94_s23 = sadd.s32 1, %s1752_s13  ;;  %s90_s25 = ssub.s32 %s87_s10, %s88_s30 }
  0x18   : > { %p101_p9 = scmp.ne.s32.totalorder %s1752_s13, %s1748_s12  ;;  %s91_s27 = sor.u32 %s90_s25, %s29_s6 }
  0x19   : > { %s2325_s3 = sadd.s32 4294967295, %s1788_s22   ;;  %p92_p11 = scmp.eq.s32.totalorder %s91_s27, 0 }
  0x1a   : > { %p133_p10 = scmp.eq.s32.totalorder %s2325_s3, 3  ;;  %p1917_p12 = por %p101_p9, %p42_p2 }
  0x1b   : > { %s1929_s26 = scalar_select %p92_p11, %s1752_s13, %s94_s23  }
  0x1c   : > { %p1924_p13 = por %p133_p10, %p41_p1  ;;  %p1506_p0 = scmp.ge.s32.totalorder %s1788_s22, 4 }
  0x1e   : > { %155 = sbr.rel (%p1506_p0) target bundleno = 65 (0x41), region = 16 }
  0x23   : > { %158 = sbr.rel (!%p1884_p4) target bundleno = 45 (0x2d), region = 20  ;;  %s160_s3 = sand.u32 (%p1884_p4), 1, %s1768_s17  }
  0x24   : > { %s1545_s25 = smul.u32 (%p1884_p4), 18, %s1784_s21 }
  0x25   : > { %s1544_s5 = smul.u32 (%p1884_p4), 12, %s160_s3 }
  0x26   : > { %s164_s6 = sadd.s32 (%p1884_p4), %s1780_s20, %s1545_s25 }
  0x27   : > { %s1507_s8 = sshll.u32 (%p1884_p4), %s164_s6, 2  ;;  %s162_s23 = scalar_lea.vmem (%p1884_p4), [#allocation2], %s1544_s5 }
  0x28   : > { %s166_s27 = scalar_lea.vmem %s2316_s0, %s1507_s8 }
  0x29   : > { %v183_v0 = vld [vmem:[%s166_s27] sm:$0xf]  ;;  %v185_v1 = vld [vmem:[%s166_s27 + $0x18] sm:$0xf]  ;;  %v187_v2 = vld [vmem:[%s166_s27 + $0x30] sm:$0xf] }
  0x2a   : > { %184 = vst [vmem:[%s162_s23] sm:$0xf] %v183_v0 }
  0x2b   : > { %186 = vst [vmem:[%s162_s23 + $0x4] sm:$0xf] %v185_v1 }
  0x2c   : > { %188 = vst [vmem:[%s162_s23 + $0x8] sm:$0xf] %v187_v2 }
  0x2d PF: > { %218 = sbr.rel (!%p1898_p8) target bundleno = 55 (0x37), region = 61  ;;  %s220_s29 = sand.u32 (%p1898_p8), 1, %s1760_s15  }
  0x2e   : > { %s1409_s3 = smul.u32 (%p1898_p8), 18, %s1784_s21 }
  0x2f   : > { %s1546_s25 = smul.u32 (%p1898_p8), 12, %s220_s29 }
  0x30   : > { %s1410_s6 = sadd.s32 (%p1898_p8), %s1780_s20, %s1409_s3 }
  0x31   : > { %s1508_s10 = sshll.u32 (%p1898_p8), %s1410_s6, 2  ;;  %s222_s5 = scalar_lea.vmem (%p1898_p8), [#allocation3], %s1546_s25 }
  0x32   : > { %s1412_s27 = scalar_lea.vmem %s2317_s1, %s1508_s10 }
  0x33   : > { %v1509_v3 = vld [vmem:[%s1412_s27 + $0x8] sm:$0xf]  ;;  %v1510_v4 = vld [vmem:[%s1412_s27 + $0x20] sm:$0xf]  ;;  %v1511_v5 = vld [vmem:[%s1412_s27 + $0x38] sm:$0xf] }
  0x34   : > { %245 = vst [vmem:[%s222_s5] sm:$0xf] %v1509_v3 }
  0x35   : > { %247 = vst [vmem:[%s222_s5 + $0x4] sm:$0xf] %v1510_v4 }
  0x36   : > { %249 = vst [vmem:[%s222_s5 + $0x8] sm:$0xf] %v1511_v5 }
  0x37 PF: > { %279 = sbr.rel (!%p1917_p12) target bundleno = 65 (0x41), region = 102  ;;  %s281_s9 = sand.u32 (%p1917_p12), 1, %s1752_s13  }
  0x38   : > { %s1416_s23 = smul.u32 (%p1917_p12), 18, %s1784_s21 }
  0x39   : > { %s1547_s29 = smul.u32 (%p1917_p12), 12, %s281_s9 }
  0x3a   : > { %s1417_s3 = sadd.s32 (%p1917_p12), %s1780_s20, %s1416_s23 }
  0x3b   : > { %s1512_s6 = sshll.u32 (%p1917_p12), %s1417_s3, 2  ;;  %s283_s25 = scalar_lea.vmem (%p1917_p12), [#allocation4], %s1547_s29 }
  0x3c   : > { %s1419_s30 = scalar_lea.vmem %s2318_s2, %s1512_s6 }
  0x3d   : > { %v1513_v6 = vld [vmem:[%s1419_s30 + $0x10] sm:$0xf]  ;;  %v1514_v7 = vld [vmem:[%s1419_s30 + $0x28] sm:$0xf]  ;;  %v1515_v8 = vld [vmem:[%s1419_s30 + $0x40] sm:$0xf] }
  0x3e   : > { %306 = vst [vmem:[%s283_s25] sm:$0xf] %v1513_v6 }
  0x3f   : > { %308 = vst [vmem:[%s283_s25 + $0x4] sm:$0xf] %v1514_v7 }
  0x40   : > { %310 = vst [vmem:[%s283_s25 + $0x8] sm:$0xf] %v1515_v8 }
  0x41 PF: > { %p1516_p1 = scmp.ge.s32.totalorder %s1788_s22, 1  ;;  %p339_p2 = scmp.lt.s32.totalorder %s1788_s22, 5 }
  0x43   : > { %p340_p3 = pnand %p1516_p1, %p339_p2 }
  0x44   : > { %s353_s4 = sand.u32 (!%p340_p3), 1, %s1756_s14   ;;  %s346_s5 = sand.u32 (!%p340_p3), 1, %s1764_s16  }
  0x45   : > { %343 = sbr.rel (%p340_p3) target bundleno = 1098 (0x44a), region = 143  ;;  %s1790_s29 = smov (!%p340_p3), 64  }
  0x46   : > { %s1549_s27 = smul.u32 (!%p340_p3), 12, %s353_s4  ;;  %s360_s14 = sand.u32 (!%p340_p3), 1, %s1748_s12  }
  0x47   : > { %s1960_s9 = smul.u32 (!%p340_p3), 12, %s346_s5 }
  0x48   : > { %s1962_s23 = scalar_lea.vmem (!%p340_p3), [#allocation3], %s1549_s27  ;;  %s1550_s16 = smul.u32 (!%p340_p3), 12, %s360_s14 }
  0x49   : > { %s1970_s3 = scalar_lea.vmem (!%p340_p3), [#allocation2], %s1960_s9  ;;  %s389_s12 = scalar_lea.vmem (!%p340_p3), [#allocation5], %s1960_s9 }
  0x4a   : > { %vm450_vm0 = vcmask 523264   ;;  %v426_v9 = vld [vmem:[%s1962_s23] sm:$0xf]  ;;  %v393_v11 = vld [vmem:[%s1970_s3] sm:$0xf]  ;;  %v489_v19 = vlaneseq  ;;  %vm498_vm2 = vcmask 64512  }
  0x4b   : > { %432 = vrot.lane.b32.xlu0 %v426_v9, %s1790_s29  ;;  %v1967_v10 = vsel %vm450_vm0, %v426_v9, 0  ;;  %v408_v12 = vunpack.c.l.bf16 %v393_v11  ;;  %s1989_s6 = scalar_lea.vmem [#allocation4], %s1550_s16  ;;  %vm524_vm3 = vcmask 1043456   ;;  %v394_v31 = vld [vmem:[%s1970_s3 + $0x4] sm:$0xf]  ;;  %vm570_vm4 = vcmask 1041408  }
  0x4c   : > { %464 = vmatpush.bf16.xpose.msra.mxu0 %v1967_v10  ;;  %v490_v22 = vshrl.u32 %v489_v19, 7  ;;  %v492_v23 = vand.u32 127, %v489_v19  ;;  %v438_v29 = vld [vmem:[%s1989_s6] sm:$0xf]  ;;  %v427_v32 = vld [vmem:[%s1962_s23 + $0x4] sm:$0xf]  ;;  %v409_v45 = vunpack.c.l.bf16 %v394_v31 }
  0x4d   : > { %v414_v13 = vmul.f32 0.125, %v408_v12  ;;  %444 = vrot.lane.b32.xlu2 %v438_v29, %s1790_s29  ;;  %v1994_v30 = vsel %vm524_vm3, %v438_v29, 0  ;;  %v428_v33 = vld [vmem:[%s1962_s23 + $0x8] sm:$0xf]  ;;  %v395_v43 = vld [vmem:[%s1970_s3 + $0x8] sm:$0xf] }
  0x4e   : > { %vm1981_vm1 = vcmp.gt.s32.totalorder %v492_v23, %v490_v22  ;;  %535 = vmatpush.bf16.msra.mxu2 %v1994_v30  ;;  %v410_v44 = vunpack.c.l.bf16 %v395_v43  ;;  %v415_v47 = vmul.f32 0.125, %v409_v45  ;;  %vm574_vm5 = vcmask 1043458   ;;  %s1551_s10 = smul.u32 (%p1924_p13), 6, %s1776_s19  ;;  %s2330_s27 = sld [smem:[#allocation7_spill]] (%p1924_p13) }
  0x4f   : > { %v420_v14 = vpack.c.bf16 %v414_v13, %v414_v13  ;;  %v597_v50 = vrot.slane %v428_v33, 2  ;;  %v596_v51 = vrot.slane %v427_v32, 2  ;;  %vm856_vm6 = vcmask 27648  }
  0x50   : > { %v416_v46 = vmul.f32 0.125, %v410_v44  ;;  %v2016_v49 = vpack.c.bf16 %v415_v47, %v415_v47  ;;  %vm881_vm7 = vcmask 60416   ;;  %vm1125_vm8 = vcmask 31744   ;;  %s1337_s8 = sadd.s32 (%p1924_p13), %s1772_s18, %s1551_s10 }
  0x51   : > { %v609_v53 = vsel %vm574_vm5, %v428_v33, %v597_v50  ;;  %v602_v54 = vsel %vm570_vm4, %v427_v32, %v596_v51  ;;  %v608_v7 = vsel %vm570_vm4, %v428_v33, %v597_v50  ;;  %v603_v13 = vsel %vm574_vm5, %v427_v32, %v596_v51  ;;  %s1541_s30 = sshll.u32 (%p1924_p13), %s1337_s8, 2 }
  0x52   : > { %v422_v48 = vpack.c.bf16 %v416_v46, %v416_v46  ;;  %v611_v55 = vrot.slane %v609_v53, 2  ;;  %v654_v56 = vsel %vm450_vm0, %v602_v54, 0  ;;  %v566_v57 = vrot.slane %v2016_v49, 2 }
  0x53   : > { %399 = vrot.lane.b32.xlu0 %v393_v11, %s1790_s29  ;;  %1517 = vmatmul.msk.bf16.vlgmr.msra.gmra.mxu0 %vm450_vm0, %v420_v14  ;;  %v690_v9 = vsel %vm450_vm0, %v608_v7, 0 }
  0x54   : > { %v567_v52 = vrot.slane %v422_v48, 2  ;;  %663 = vmatpush.bf16.xpose.msrb.mxu2 %v654_v56  ;;  %v709_v58 = vsel %vm450_vm0, %v611_v55, 0  ;;  %v573_v60 = vsel %vm570_vm4, %v2016_v49, %v566_v57  ;;  %699 = vmatpush.bf16.xpose.msrb.mxu0 %v690_v9  ;;  %s1339_s5 = scalar_lea.vmem (%p1924_p13), %s2330_s27, %s1541_s30 }
  0x55   : > { %434 = vrot.lane.b32.xlu2 %v427_v32, %s1790_s29 }
  0x56   : > { %v581_v59 = vsel %vm574_vm5, %v422_v48, %v567_v52 }
  0x57   : > { %v583_v61 = vrot.slane %v581_v59, 2 }
  0x5b   : > { %401 = vrot.lane.b32.xlu0 %v394_v31, %s1790_s29 }
  0x5d   : > { %436 = vrot.lane.b32.xlu2 %v428_v33, %s1790_s29 }
  0xa7   : > { %v445_v62 = vpop.permute.xlu2 %444 }
  0xa8   : > { %v545_v63 = vsel %vm524_vm3, %v445_v62, 0 }
  0xa9   : > { %554 = vmatpush.bf16.msra.mxu3 %v545_v63 }
  0xaf   : > { %v435_v0 = vpop.permute.xlu2 %434 }
  0xb0   : > { %v598_v6 = vrot.slane %v435_v0, 2 }
  0xb2   : > { %v614_v8 = vsel %vm570_vm4, %v435_v0, %v598_v6  ;;  %v615_v32 = vsel %vm574_vm5, %v435_v0, %v598_v6 }
  0xb3   : > { %v726_v12 = vsel %vm450_vm0, %v614_v8, 0  ;;  %v617_v33 = vrot.slane %v615_v32, 2 }
  0xb7   : > { %v437_v1 = vpop.permute.xlu2 %436 }
  0xb8   : > { %v599_v2 = vrot.slane %v437_v1, 2 }
  0xba   : > { %v621_v3 = vsel %vm574_vm5, %v437_v1, %v599_v2 }
  0xbb   : > { %v623_v4 = vrot.slane %v621_v3, 2 }
  0xbd   : > { %v433_v15 = vpop.permute.xlu0 %432  ;;  %v781_v5 = vsel %vm450_vm0, %v623_v4, 0 }
  0xbe   : > { %v1977_v16 = vsel %vm450_vm0, %v433_v15, 0  ;;  %v605_v15 = vrot.slane %v603_v13, 2 }
  0xbf   : > { %483 = vmatpush.bf16.xpose.msra.mxu1 %v1977_v16 }
  0xc0   : > { %v673_v19 = vsel %vm450_vm0, %v605_v15, 0 }
  0xc1   : > { %682 = vmatpush.bf16.xpose.msrb.mxu3 %v673_v19 }
  0xc5   : > { %v400_v17 = vpop.permute.xlu0 %399 }
  0xc6   : > { %v411_v18 = vunpack.c.l.bf16 %v400_v17  ;;  %v580_v17 = vsel %vm570_vm4, %v422_v48, %v567_v52 }
  0xc7   : > { %718 = vmatpush.bf16.xpose.msrb.mxu1 %v709_v58  ;;  %1523 = vmatmul.msk.bf16.vlgmr.msrb.gmra.mxu0 %vm450_vm0, %v580_v17 }
  0xc8   : > { %v417_v20 = vmul.f32 0.125, %v411_v18 }
  0xca   : > { %v423_v21 = vpack.c.bf16 %v417_v20, %v417_v20 }
  0xcc   : > { %1518 = vmatmul.msk.bf16.vlgmr.msra.gmra.mxu1 %vm450_vm0, %v423_v21  ;;  %v620_v21 = vsel %vm570_vm4, %v437_v1, %v599_v2 }
  0xcd   : > { %v402_v11 = vpop.permute.xlu0 %401 }
  0xce   : > { %v412_v14 = vunpack.c.l.bf16 %v402_v11 }
  0xcf   : > { %790 = vmatpush.bf16.xpose.msra.mxu1 %v781_v5 }
  0xd0   : > { %v466_v25 = vpop.f32.mrf.mxu0  ;;  %v418_v18 = vmul.f32 0.125, %v412_v14 }
  0xd1   : > { %v496_v26 = vsel %vm1981_vm1, -3.4028235e+38, %v466_v25  ;;  %v762_v25 = vsel %vm450_vm0, %v620_v21, 0 }
  0xd2   : > { %v499_v27 = vsel %vm498_vm2, %v496_v26, -inf  ;;  %v424_v20 = vpack.c.bf16 %v418_v18, %v418_v18  ;;  %771 = vmatpush.bf16.xpose.msra.mxu0 %v762_v25 }
  0xd3   : > { %500 = vmax.xlane.f32.xlu1 %v499_v27 }
  0xd4   : > { %v568_v22 = vrot.slane %v424_v20, 2  ;;  %v816_v52 = vunpack.c.l.b16 %v424_v20 }
  0xd6   : > { %v586_v23 = vsel %vm570_vm4, %v424_v20, %v568_v22 }
  0xd8   : > { %v468_v28 = vpop.f32.mrf.mxu0 }
  0xda   : > { %1084 = vmatpush.bf16.msrb.mxu0 %v1994_v30  ;;  %v745_v30 = vsel %vm450_vm0, %v617_v33, 0 }
  0xdc   : > { %1524 = vmatmul.msk.bf16.vlgmr.msrb.gmra.mxu1 %vm450_vm0, %v583_v61 }
  0xdd   : > { %1106 = vmatpush.bf16.msrb.mxu1 %v545_v63 }
 0x144   : > { %v701_v55 = vpop.f32.mrf.mxu0 }
 0x145   : > { %v2070_v56 = vsel %vm1981_vm1, -3.4028235e+38, %v701_v55 }
 0x146   : > { %v501_v34 = vpop.xlane.xlu1 %500 }
 0x147   : > { %v505_v35 = vsub.f32 %v496_v26, %v501_v34  ;;  %v797_v26 = vunpack.c.l.b16 %v422_v48 }
 0x149   : > { %v507_v36 = vmul.f32 1.442695, %v505_v35  ;;  %v485_v37 = vpop.f32.mrf.mxu1 }
 0x14a   : > { %v2005_v38 = vsel %vm1981_vm1, -3.4028235e+38, %v485_v37 }
 0x14b   : > { %1646 = vpow2.f32 %v507_v36  ;;  %v502_v39 = vsel %vm498_vm2, %v2005_v38, -inf  ;;  %v575_v36 = vsel %vm574_vm5, %v2016_v49, %v566_v57 }
 0x14c   : > { %503 = vmax.xlane.f32.xlu1 %v502_v39  ;;  %v703_v57 = vpop.f32.mrf.mxu0 }
 0x151   : > { %v2009_v40 = vpop.eup %1646  ;;  %v487_v41 = vpop.f32.mrf.mxu1 }
 0x152   : > { %v519_v42 = vpack.c.bf16 %v2009_v40, %v2009_v40  ;;  %v577_v41 = vrot.slane %v575_v36, 2 }
 0x154   : > { %1519 = vmatmul.msk.bf16.vlgmr.msra.gmra.mxu2 %vm498_vm2, %v519_v42 }
 0x155   : > { %735 = vmatpush.bf16.xpose.msra.mxu2 %v726_v12 }
 0x159   : > { %v720_v58 = vpop.f32.mrf.mxu1 }
 0x15a   : > { %v2076_v61 = vsel %vm1981_vm1, -3.4028235e+38, %v720_v58 }
 0x15b   : > { %v866_v63 = vsel %vm856_vm6, %v2076_v61, -inf }
 0x15c   : > { %867 = vmax.xlane.f32.xlu2 %v866_v63 }
 0x161   : > { %v722_v62 = vpop.f32.mrf.mxu1 }
 0x164   : > { %1521 = vmatmul.msk.bf16.vlgmr.msrb.gmra.mxu2 %vm450_vm0, %v573_v60  ;;  %v863_v60 = vsel %vm856_vm6, %v2070_v56, -inf }
 0x165   : > { %403 = vrot.lane.b32.xlu1 %v395_v43, %s1790_s29  ;;  %809 = vmatpush.bf16.xpose.msrb.mxu2 %v1967_v10  ;;  %v796_v10 = vunpack.c.l.b16 %v2016_v49  ;;  %v587_v49 = vsel %vm574_vm5, %v424_v20, %v568_v22 }
 0x166   : > { %v589_v50 = vrot.slane %v587_v49, 2 }
 0x167   : > { %v798_v27 = vpack.c.b16 %v797_v26, %v796_v10 }
 0x174   : > { %1525 = vmatmul.msk.bf16.vlgmr.msra.gmra.mxu2 %vm450_vm0, %v586_v23 }
 0x184   : > { %1529 = vmatmul.msk.bf16.vlgmr.msrb.gmra.mxu2 %vm450_vm0, %v798_v27 }
 0x18f   : > { %864 = vmax.xlane.f32.xlu1 %v863_v60 }
 0x1bf   : > { %v504_v28 = vpop.xlane.xlu1 %503 }
 0x1c0   : > { %v506_v29 = vsub.f32 %v2005_v38, %v504_v28 }
 0x1c2   : > { %v509_v31 = vmul.f32 1.442695, %v506_v29 }
 0x1c4   : > { %1648 = vpow2.f32 %v509_v31 }
 0x1ca   : > { %v2049_v34 = vpop.eup %1648 }
 0x1cb   : > { %v520_v35 = vpack.c.bf16 %v2049_v34, %v2049_v34 }
 0x1cd   : > { %1520 = vmatmul.msk.bf16.vlgmr.msra.gmra.mxu3 %vm498_vm2, %v520_v35 }
 0x1ce   : > { %754 = vmatpush.bf16.xpose.msra.mxu3 %v745_v30 }
 0x1d7   : > { %v2057_v37 = vpop.f32.mrf.mxu2  ;;  %v404_v38 = vpop.permute.xlu1 %403 }
 0x1d8   : > { %v413_v39 = vunpack.c.l.bf16 %v404_v38 }
 0x1da   : > { %v419_v42 = vmul.f32 0.125, %v413_v39 }
 0x1dc   : > { %v425_v43 = vpack.c.bf16 %v419_v42, %v419_v42 }
 0x1dd   : > { %1522 = vmatmul.msk.bf16.vlgmr.msrb.gmra.mxu3 %vm450_vm0, %v577_v41 }
 0x1de   : > { %v569_v44 = vrot.slane %v425_v43, 2  ;;  %829 = vmatpush.bf16.xpose.msrb.mxu3 %v1977_v16  ;;  %v817_v51 = vunpack.c.l.b16 %v425_v43 }
 0x1df   : > { %v539_v45 = vpop.f32.mrf.mxu2 }
 0x1e0   : > { %v593_v46 = vsel %vm574_vm5, %v425_v43, %v569_v44  ;;  %v592_v47 = vsel %vm570_vm4, %v425_v43, %v569_v44  ;;  %v818_v53 = vpack.c.b16 %v817_v51, %v816_v52  ;;  %v439_v43 = vld [vmem:[%s1989_s6 + $0x4] sm:$0xf]  ;;  %v2149_v44 = vld [vmem:[%s1989_s6 + $0x8] sm:$0xf] }
 0x1e1   : > { %v595_v48 = vrot.slane %v593_v46, 2  ;;  %1527 = vmatmul.msk.bf16.vlgmr.msra.gmra.mxu0 %vm450_vm0, %v592_v47  ;;  %v624_v45 = vrot.slane %v439_v43, 2  ;;  %v868_v46 = vpop.xlane.xlu2 %867 }
 0x1e3   : > { %1528 = vmatmul.msk.bf16.vlgmr.msra.gmra.mxu1 %vm450_vm0, %v595_v48  ;;  %v631_v47 = vsel %vm574_vm5, %v439_v43, %v624_v45  ;;  %v630_v52 = vsel %vm570_vm4, %v439_v43, %v624_v45 }
 0x1e4   : > { %v633_v48 = vrot.slane %v631_v47, 2 }
 0x1e6   : > { %v1148_v49 = vsel %vm570_vm4, %v633_v48, 0 }
 0x1e7   : > { %v665_v16 = vpop.f32.mrf.mxu2 }
 0x1e8   : > { %v2102_v14 = vsel %vm1981_vm1, -3.4028235e+38, %v665_v16 }
 0x1e9   : > { %v857_v20 = vsel %vm856_vm6, %v2102_v14, -inf }
 0x1ed   : > { %1526 = vmatmul.msk.bf16.vlgmr.msra.gmra.mxu3 %vm450_vm0, %v589_v50 }
 0x1ee   : > { %1157 = vmatpush.bf16.msra.mxu3 %v1148_v49 }
 0x1ef   : > { %v667_v54 = vpop.f32.mrf.mxu2 }
 0x1f7   : > { %v737_v59 = vpop.f32.mrf.mxu2 }
 0x1f8   : > { %v2112_v22 = vsel %vm1981_vm1, -3.4028235e+38, %v737_v59 }
 0x1f9   : > { %v869_v10 = vsel %vm856_vm6, %v2112_v22, -inf }
 0x1fd   : > { %1530 = vmatmul.msk.bf16.vlgmr.msrb.gmra.mxu3 %vm450_vm0, %v818_v53  ;;  %v1129_v53 = vsel %vm570_vm4, %v630_v52, 0 }
 0x1fe   : > { %1138 = vmatpush.bf16.msra.mxu2 %v1129_v53 }
 0x1ff   : > { %v739_v0 = vpop.f32.mrf.mxu2 }
 0x202   : > { %v865_v16 = vpop.xlane.xlu1 %864 }
 0x207   : > { %v2082_v2 = vpop.f32.mrf.mxu2 }
 0x208   : > { %v840_v3 = vrot.slane %v2082_v2, 4  ;;  %v882_v29 = vsel %vm881_vm7, %v2082_v2, -inf }
 0x20a   : > { %v885_v4 = vsel %vm881_vm7, %v840_v3, -inf }
 0x20b   : > { %886 = vmax.xlane.f32.xlu1 %v885_v4 }
 0x20f   : > { %v2104_v15 = vpop.f32.mrf.mxu2 }
 0x210   : > { %v888_v21 = vsel %vm881_vm7, %v2104_v15, -inf  ;;  %v841_v32 = vrot.slane %v2104_v15, 4 }
 0x212   : > { %v891_v24 = vsel %vm881_vm7, %v841_v32, -inf }
 0x250   : > { %v2080_v1 = vpop.f32.mrf.mxu3 }
 0x258   : > { %v558_v5 = vpop.f32.mrf.mxu3 }
 0x25e   : > { %v773_v6 = vpop.f32.mrf.mxu0 }
 0x25f   : > { %v2090_v7 = vsel %vm1981_vm1, -3.4028235e+38, %v773_v6 }
 0x260   : > { %v684_v8 = vpop.f32.mrf.mxu3  ;;  %v792_v9 = vpop.f32.mrf.mxu1  ;;  %v875_v11 = vsel %vm856_vm6, %v2090_v7, -inf }
 0x261   : > { %v2096_v12 = vsel %vm1981_vm1, -3.4028235e+38, %v792_v9  ;;  %876 = vmax.xlane.f32.xlu0 %v875_v11  ;;  %v849_v23 = vsel %vm1981_vm1, -3.4028235e+38, %v684_v8 }
 0x262   : > { %v878_v13 = vsel %vm856_vm6, %v2096_v12, -inf  ;;  %v860_v26 = vsel %vm856_vm6, %v849_v23, -inf }
 0x263   : > { %879 = vmax.xlane.f32.xlu2 %v878_v13 }
 0x266   : > { %v775_v17 = vpop.f32.mrf.mxu0 }
 0x268   : > { %v686_v18 = vpop.f32.mrf.mxu3  ;;  %v794_v19 = vpop.f32.mrf.mxu1 }
 0x269   : > { %858 = vmax.xlane.f32.xlu0 %v857_v20 }
 0x26b   : > { %889 = vmax.xlane.f32.xlu2 %v888_v21 }
 0x270   : > { %v756_v25 = vpop.f32.mrf.mxu3 }
 0x271   : > { %870 = vmax.xlane.f32.xlu0 %v869_v10  ;;  %v2121_v27 = vsel %vm1981_vm1, -3.4028235e+38, %v756_v25 }
 0x272   : > { %v872_v31 = vsel %vm856_vm6, %v2121_v27, -inf }
 0x273   : > { %861 = vmax.xlane.f32.xlu2 %v860_v26 }
 0x278   : > { %v758_v28 = vpop.f32.mrf.mxu3 }
 0x279   : > { %883 = vmax.xlane.f32.xlu0 %v882_v29 }
 0x27b   : > { %873 = vmax.xlane.f32.xlu2 %v872_v31 }
 0x27e   : > { %v887_v62 = vpop.xlane.xlu1 %886 }
 0x280   : > { %v2128_v33 = vpop.f32.mrf.mxu3 }
 0x281   : > { %892 = vmax.xlane.f32.xlu0 %v891_v24  ;;  %v894_v35 = vsel %vm881_vm7, %v2128_v33, -inf  ;;  %v842_v30 = vrot.slane %v2128_v33, 4 }
 0x282   : > { %895 = vmax.xlane.f32.xlu1 %v894_v35 }
 0x283   : > { %v897_v36 = vsel %vm881_vm7, %v842_v30, -inf }
 0x284   : > { %898 = vmax.xlane.f32.xlu2 %v897_v36 }
 0x288   : > { %v2139_v38 = vpop.f32.mrf.mxu3 }
 0x289   : > { %v900_v39 = vsel %vm881_vm7, %v2139_v38, -inf  ;;  %v843_v41 = vrot.slane %v2139_v38, 4 }
 0x28a   : > { %901 = vmax.xlane.f32.xlu0 %v900_v39 }
 0x28b   : > { %v903_v42 = vsel %vm881_vm7, %v843_v41, -inf }
 0x28c   : > { %904 = vmax.xlane.f32.xlu1 %v903_v42  ;;  %v625_v42 = vrot.slane %v2149_v44, 2 }
 0x29c   : > { %446 = vrot.lane.b32.xlu2 %v439_v43, %s1790_s29 }
 0x29e   : > { %448 = vrot.lane.b32.xlu0 %v2149_v44, %s1790_s29 }
 0x2d4   : > { %v2156_v50 = vpop.xlane.xlu0 %876 }
 0x2d6   : > { %v2158_v51 = vpop.xlane.xlu2 %879 }
 0x2dc   : > { %v859_v54 = vpop.xlane.xlu0 %858 }
 0x2de   : > { %v890_v55 = vpop.xlane.xlu2 %889 }
 0x2df   : > { %v908_v57 = vmax.f32 %v865_v16, %v890_v55 }
 0x2e1   : > { %v940_v58 = vsub.f32 %v2104_v15, %v908_v57  ;;  %v916_v20 = vsub.f32 %v2070_v56, %v908_v57 }
 0x2e3   : > { %v950_v59 = vmul.f32 1.442695, %v940_v58  ;;  %v926_v10 = vmul.f32 1.442695, %v916_v20 }
 0x2e4   : > { %v871_v60 = vpop.xlane.xlu0 %870 }
 0x2e5   : > { %1650 = vpow2.f32 %v950_v59 }
 0x2e6   : > { %v862_v63 = vpop.xlane.xlu2 %861 }
 0x2e7   : > { %v907_v0 = vmax.f32 %v862_v63, %v887_v62 }
 0x2e9   : > { %v915_v4 = vsub.f32 %v849_v23, %v907_v0  ;;  %v939_v5 = vsub.f32 %v840_v3, %v907_v0 }
 0x2eb   : > { %v924_v6 = vmul.f32 1.442695, %v915_v4  ;;  %v948_v8 = vmul.f32 1.442695, %v939_v5  ;;  %v2165_v9 = vpop.eup %1650 }
 0x2ec   : > { %v884_v11 = vpop.xlane.xlu0 %883  ;;  %1046 = vst [vmem:[#allocation1 + $0x10] ss:$2 sm:$0xff] %v2165_v9 }
 0x2ed   : > { %1652 = vpow2.f32 %v924_v6  ;;  %v906_v13 = vmax.f32 %v859_v54, %v884_v11  ;;  %v637_v11 = vsel %vm574_vm5, %v2149_v44, %v625_v42 }
 0x2ee   : > { %1654 = vpow2.f32 %v948_v8  ;;  %v874_v17 = vpop.xlane.xlu2 %873 }
 0x2ef   : > { %v914_v18 = vsub.f32 %v2102_v14, %v906_v13  ;;  %v938_v19 = vsub.f32 %v2082_v2, %v906_v13 }
 0x2f1   : > { %v922_v21 = vmul.f32 1.442695, %v914_v18  ;;  %v946_v23 = vmul.f32 1.442695, %v938_v19 }
 0x2f3   : > { %v2171_v3 = vpop.eup %1652  ;;  %1656 = vpow2.f32 %v922_v21 }
 0x2f4   : > { %v2173_v25 = vpop.eup %1654  ;;  %v1027_v26 = vpack.c.bf16 %v2171_v3, %v2171_v3  ;;  %1658 = vpow2.f32 %v946_v23  ;;  %v893_v28 = vpop.xlane.xlu0 %892 }
 0x2f5   : > { %1044 = vst [vmem:[#allocation1 + $0x1] ss:$2 sm:$0xff] %v2173_v25  ;;  %v909_v14 = vmax.f32 %v868_v46, %v893_v28  ;;  %v896_v2 = vpop.xlane.xlu1 %895  ;;  %1660 = vpow2.f32 %v926_v10  ;;  %v639_v10 = vrot.slane %v637_v11, 2 }
 0x2f6   : > { %v910_v29 = vmax.f32 %v871_v60, %v896_v2  ;;  %1534 = vmatmul.msk.bf16.vlgmr.msra.gmra.mxu3 %vm1125_vm8, %v1027_v26 }
 0x2f7   : > { %v917_v56 = vsub.f32 %v2076_v61, %v909_v14  ;;  %v941_v31 = vsub.f32 %v841_v32, %v909_v14  ;;  %v899_v24 = vpop.xlane.xlu2 %898  ;;  %v1185_v14 = vsel %vm570_vm4, %v639_v10, 0 }
 0x2f8   : > { %v942_v35 = vsub.f32 %v2128_v33, %v910_v29  ;;  %v911_v36 = vmax.f32 %v874_v17, %v899_v24  ;;  %v918_v46 = vsub.f32 %v2112_v22, %v910_v29  ;;  %1194 = vmatpush.bf16.msra.mxu1 %v1185_v14 }
 0x2f9   : > { %v1657_v39 = vpop.eup %1656  ;;  %v928_v43 = vmul.f32 1.442695, %v917_v56  ;;  %v952_v45 = vmul.f32 1.442695, %v941_v31 }
 0x2fa   : > { %v1659_v47 = vpop.eup %1658  ;;  %v1026_v48 = vpack.c.bf16 %v1657_v39, %v1657_v39  ;;  %v954_v49 = vmul.f32 1.442695, %v942_v35  ;;  %v919_v61 = vsub.f32 %v2121_v27, %v911_v36  ;;  %v943_v15 = vsub.f32 %v842_v30, %v911_v36 }
 0x2fb   : > { %1042 = vst [vmem:[#allocation1] ss:$2 sm:$0xff] %v1659_v47  ;;  %1662 = vpow2.f32 %v928_v43  ;;  %v986_v32 = vsel %vm881_vm7, %v1659_v47, 0.0  ;;  %v962_v52 = vsel %vm856_vm6, %v1657_v39, 0.0  ;;  %v930_v16 = vmul.f32 1.442695, %v918_v46  ;;  %v2193_v55 = vpop.eup %1660 }
 0x2fc   : > { %1664 = vpow2.f32 %v952_v45  ;;  %v932_v53 = vmul.f32 1.442695, %v919_v61  ;;  %987 = vadd.xlane.f32.xlu2 %v986_v32  ;;  %963 = vadd.xlane.f32.xlu1 %v962_v52  ;;  %v956_v22 = vmul.f32 1.442695, %v943_v15  ;;  %v636_v27 = vsel %vm570_vm4, %v2149_v44, %v625_v42 }
 0x2fd   : > { %1533 = vmatmul.msk.bf16.vlgmr.msra.gmra.mxu2 %vm1125_vm8, %v1026_v48  ;;  %v902_v54 = vpop.xlane.xlu0 %901  ;;  %1666 = vpow2.f32 %v954_v49  ;;  %v1166_v30 = vsel %vm570_vm4, %v636_v27, 0  ;;  %v992_v35 = vsel %vm881_vm7, %v2165_v9, 0.0 }
 0x2fe   : > { %v912_v33 = vmax.f32 %v2156_v50, %v902_v54  ;;  %1668 = vpow2.f32 %v932_v53  ;;  %1175 = vmatpush.bf16.msra.mxu0 %v1166_v30  ;;  %v968_v50 = vsel %vm856_vm6, %v2193_v55, 0.0 }
 0x2ff   : > { %v447_v57 = vpop.permute.xlu2 %446  ;;  %v905_v58 = vpop.xlane.xlu1 %904  ;;  %1670 = vpow2.f32 %v956_v22 }
 0x300   : > { %v920_v59 = vsub.f32 %v2090_v7, %v912_v33  ;;  %v944_v60 = vsub.f32 %v2139_v38, %v912_v33  ;;  %v626_v62 = vrot.slane %v447_v57, 2  ;;  %1672 = vpow2.f32 %v930_v16 }
 0x301   : > { %v2199_v63 = vpop.eup %1662  ;;  %v913_v0 = vmax.f32 %v2158_v51, %v905_v58 }
 0x302   : > { %v1665_v4 = vpop.eup %1664  ;;  %v934_v5 = vmul.f32 1.442695, %v920_v59  ;;  %v958_v6 = vmul.f32 1.442695, %v944_v60  ;;  %v642_v8 = vsel %vm570_vm4, %v447_v57, %v626_v62  ;;  %v643_v7 = vsel %vm574_vm5, %v447_v57, %v626_v62 }
 0x303   : > { %1048 = vst [vmem:[#allocation1 + $0x11] ss:$2 sm:$0xff] %v1665_v4  ;;  %v921_v13 = vsub.f32 %v2096_v12, %v913_v0  ;;  %v945_v17 = vsub.f32 %v843_v41, %v913_v0  ;;  %v971_v51 = vsel %vm856_vm6, %v2199_v63, 0.0  ;;  %v2213_v18 = vpop.eup %1666  ;;  %v645_v19 = vrot.slane %v643_v7, 2 }
 0x304   : > { %1674 = vpow2.f32 %v934_v5  ;;  %969 = vadd.xlane.f32.xlu1 %v968_v50  ;;  %972 = vadd.xlane.f32.xlu0 %v971_v51  ;;  %v1203_v20 = vsel %vm570_vm4, %v642_v8, 0  ;;  %v2216_v44 = vpop.eup %1668  ;;  %1052 = vst [vmem:[#allocation1 + $0x20] ss:$2 sm:$0xff] %v2213_v18  ;;  %v1049_v23 = vld.sshfl [vmem:[#allocation1] sm:$0xff pattern:$0x75316420] }
 0x305   : > { %1676 = vpow2.f32 %v958_v6  ;;  %v936_v12 = vmul.f32 1.442695, %v921_v13  ;;  %v960_v21 = vmul.f32 1.442695, %v945_v17  ;;  %1212 = vmatpush.bf16.msrb.mxu2 %v1203_v20  ;;  %v1671_v38 = vpop.eup %1670  ;;  %v1222_v41 = vsel %vm570_vm4, %v645_v19, 0 }
 0x306   : > { %v2220_v26 = vpop.eup %1672  ;;  %1054 = vst [vmem:[#allocation1 + $0x21] ss:$2 sm:$0xff] %v1671_v38  ;;  %1231 = vmatpush.bf16.msrb.mxu3 %v1222_v41  ;;  %v1031_v28 = vpack.c.bf16 %v2216_v44, %v2216_v44  ;;  %v1065_v2 = vpack.c.bf16 %v1049_v23, %v1049_v23  ;;  %v995_v15 = vsel %vm881_vm7, %v1665_v4, 0.0  ;;  %v1001_v32 = vsel %vm881_vm7, %v1671_v38, 0.0 }
 0x307   : > { %1678 = vpow2.f32 %v936_v12  ;;  %v1030_v24 = vpack.c.bf16 %v2220_v26, %v2220_v26  ;;  %v965_v59 = vsel %vm856_vm6, %v2171_v3, 0.0  ;;  %v514_v62 = vsel %vm498_vm2, %v2049_v34, 0.0 }
 0x308   : > { %1680 = vpow2.f32 %v960_v21  ;;  %v1071_v43 = vunpack.c.l.b16 %v1065_v2  ;;  %v511_v50 = vsel %vm498_vm2, %v2009_v40, 0.0  ;;  %v1028_v4 = vpack.c.bf16 %v2193_v55, %v2193_v55 }
 0x309   : > { %1538 = vmatmul.msk.bf16.vlgmr.msrb.gmra.mxu3 %vm1125_vm8, %v1031_v28  ;;  %v989_v3 = vsel %vm881_vm7, %v2173_v25, 0.0  ;;  %v1029_v34 = vpack.c.bf16 %v2199_v63, %v2199_v63  ;;  %v974_v5 = vsel %vm856_vm6, %v2220_v26, 0.0  ;;  %v998_v55 = vsel %vm881_vm7, %v2213_v18, 0.0 }
 0x30a   : > { %v1675_v29 = vpop.eup %1674  ;;  %v1050_v56 = vld.sshfl [vmem:[#allocation1 + $0x10] sm:$0xff pattern:$0x75316420]  ;;  %v977_v25 = vsel %vm856_vm6, %v2216_v44, 0.0 }
 0x30b   : > { %v1677_v31 = vpop.eup %1676  ;;  %v980_v36 = vsel %vm856_vm6, %v1675_v29, 0.0  ;;  %v1066_v39 = vpack.c.bf16 %v1050_v56, %v1050_v56  ;;  %v1032_v40 = vpack.c.bf16 %v1675_v29, %v1675_v29 }
 0x30c   : > { %1056 = vst [vmem:[#allocation1 + $0x30] ss:$2 sm:$0xff] %v1677_v31  ;;  %993 = vadd.xlane.f32.xlu1 %v992_v35  ;;  %981 = vadd.xlane.f32.xlu0 %v980_v36  ;;  %v1004_v54 = vsel %vm881_vm7, %v1677_v31, 0.0 }
 0x30d   : > { %v1679_v42 = vpop.eup %1678  ;;  %1537 = vmatmul.msk.bf16.vlgmr.msrb.gmra.mxu2 %vm1125_vm8, %v1030_v24  ;;  %v1072_v45 = vunpack.c.l.b16 %v1066_v39  ;;  %v1059_v61 = vld.sshfl [vmem:[#allocation1 + $0x20] sm:$0xff pattern:$0x75316420] }
 0x30e   : > { %v1681_v46 = vpop.eup %1680  ;;  %v983_v47 = vsel %vm856_vm6, %v1679_v42, 0.0  ;;  %v1067_v22 = vpack.c.bf16 %v1059_v61, %v1059_v61  ;;  %v1033_v6 = vpack.c.bf16 %v1679_v42, %v1679_v42 }
 0x30f   : > { %1058 = vst [vmem:[#allocation1 + $0x31] ss:$2 sm:$0xff] %v1681_v46  ;;  %984 = vadd.xlane.f32.xlu2 %v983_v47  ;;  %v1073_v48 = vpack.c.b16 %v1072_v45, %v1071_v43  ;;  %v1007_v63 = vsel %vm881_vm7, %v1681_v46, 0.0 }
 0x310   : > { %v449_v49 = vpop.permute.xlu0 %448  ;;  %v1093_v57 = vunpack.c.l.b16 %v1067_v22 }
 0x311   : > { %1531 = vmatmul.msk.bf16.vlgmr.msrb.gmra.mxu0 %vm498_vm2, %v1073_v48  ;;  %v627_v9 = vrot.slane %v449_v49, 2 }
 0x313   : > { %v648_v52 = vsel %vm570_vm4, %v449_v49, %v627_v9  ;;  %v649_v53 = vsel %vm574_vm5, %v449_v49, %v627_v9 }
 0x314   : > { %996 = vadd.xlane.f32.xlu1 %v995_v15  ;;  %1002 = vadd.xlane.f32.xlu0 %v1001_v32  ;;  %v1240_v16 = vsel %vm570_vm4, %v648_v52, 0  ;;  %v651_v30 = vrot.slane %v649_v53, 2 }
 0x315   : > { %1249 = vmatpush.bf16.msrb.mxu0 %v1240_v16 }
 0x316   : > { %v1060_v27 = vld.sshfl [vmem:[#allocation1 + $0x30] sm:$0xff pattern:$0x75316420]  ;;  %v1259_v0 = vsel %vm570_vm4, %v651_v30, 0 }
 0x317   : > { %1005 = vadd.xlane.f32.xlu2 %v1004_v54  ;;  %v1068_v33 = vpack.c.bf16 %v1060_v27, %v1060_v27 }
 0x319   : > { %v1094_v58 = vunpack.c.l.b16 %v1068_v33 }
 0x31b   : > { %v1095_v60 = vpack.c.b16 %v1094_v58, %v1093_v57 }
 0x31c   : > { %966 = vadd.xlane.f32.xlu1 %v965_v59  ;;  %515 = vadd.xlane.f32.xlu0 %v514_v62 }
 0x31d   : > { %1532 = vmatmul.msk.bf16.vlgmr.msrb.gmra.mxu1 %vm498_vm2, %v1095_v60 }
 0x31e   : > { %1268 = vmatpush.bf16.msrb.mxu1 %v1259_v0 }
 0x31f   : > { %512 = vadd.xlane.f32.xlu2 %v511_v50 }
 0x321   : > { %1535 = vmatmul.msk.bf16.vlgmr.msra.gmra.mxu0 %vm1125_vm8, %v1028_v4 }
 0x324   : > { %990 = vadd.xlane.f32.xlu1 %v989_v3 }
 0x32c   : > { %975 = vadd.xlane.f32.xlu1 %v974_v5 }
 0x32d   : > { %1536 = vmatmul.msk.bf16.vlgmr.msra.gmra.mxu1 %vm1125_vm8, %v1029_v34 }
 0x331   : > { %1539 = vmatmul.msk.bf16.vlgmr.msrb.gmra.mxu0 %vm1125_vm8, %v1032_v40 }
 0x334   : > { %999 = vadd.xlane.f32.xlu1 %v998_v55 }
 0x33c   : > { %978 = vadd.xlane.f32.xlu1 %v977_v25 }
 0x33d   : > { %1540 = vmatmul.msk.bf16.vlgmr.msrb.gmra.mxu1 %vm1125_vm8, %v1033_v6 }
 0x344   : > { %1008 = vadd.xlane.f32.xlu1 %v1007_v63 }
 0x36f   : > { %v964_v8 = vpop.xlane.xlu1 %963  ;;  %v988_v19 = vpop.xlane.xlu2 %987 }
 0x370   : > { %v1010_v20 = vadd.f32 %v988_v19, %v964_v8 }
 0x372   : > { %1682 = vrcp.f32 %v1010_v20 }
 0x377   : > { %v970_v11 = vpop.xlane.xlu1 %969  ;;  %v973_v29 = vpop.xlane.xlu0 %972 }
 0x378   : > { %v1683_v23 = vpop.eup %1682 }
 0x379   : > { %v1159_v7 = vpop.f32.mrf.mxu3 }
 0x37f   : > { %v994_v13 = vpop.xlane.xlu1 %993  ;;  %v982_v49 = vpop.xlane.xlu0 %981 }
 0x380   : > { %v1140_v17 = vpop.f32.mrf.mxu2  ;;  %v1012_v28 = vadd.f32 %v994_v13, %v970_v11 }
 0x381   : > { %v1161_v51 = vpop.f32.mrf.mxu3 }
 0x382   : > { %1684 = vrcp.f32 %v1012_v28  ;;  %v985_v39 = vpop.xlane.xlu2 %984 }
 0x387   : > { %v997_v18 = vpop.xlane.xlu1 %996  ;;  %v1003_v30 = vpop.xlane.xlu0 %1002 }
 0x388   : > { %v1142_v12 = vpop.f32.mrf.mxu2  ;;  %v1685_v43 = vpop.eup %1684  ;;  %v1013_v15 = vadd.f32 %v997_v18, %v973_v29 }
 0x38a   : > { %v1006_v53 = vpop.xlane.xlu2 %1005 }
 0x38b   : > { %v1016_v27 = vadd.f32 %v1006_v53, %v982_v49 }
 0x38c   : > { %v2265_v21 = vpop.f32.mrf.mxu3 }
 0x38e   : > { %v1086_v44 = vpop.f32.mrf.mxu0 }
 0x38f   : > { %v1141_v38 = vadd.f32 %v1140_v17, %v1086_v44  ;;  %v967_v41 = vpop.xlane.xlu1 %966  ;;  %v1117_v36 = vrot.slane %v1086_v44, 4  ;;  %v516_v25 = vpop.xlane.xlu0 %515 }
 0x390   : > { %v1214_v10 = vpop.f32.mrf.mxu2 }
 0x391   : > { %v1274_v26 = vmul.f32 %v1683_v23, %v1141_v38  ;;  %v1160_v45 = vadd.f32 %v1159_v7, %v1117_v36 }
 0x393   : > { %1293 = vst [vmem:[#allocation1] ss:$2 sm:$0xff] %v1274_v26 }
 0x394   : > { %v1235_v14 = vpop.f32.mrf.mxu3 }
 0x395   : > { %v513_v14 = vpop.xlane.xlu2 %512 }
 0x396   : > { %v1088_v2 = vpop.f32.mrf.mxu0 }
 0x397   : > { %v991_v56 = vpop.xlane.xlu1 %990  ;;  %v1118_v54 = vrot.slane %v1088_v2, 4 }
 0x398   : > { %v1011_v31 = vadd.f32 %v991_v56, %v967_v41  ;;  %v1216_v24 = vpop.f32.mrf.mxu2 }
 0x39a   : > { %1686 = vrcp.f32 %v1011_v31  ;;  %v1108_v35 = vpop.f32.mrf.mxu1 }
 0x39b   : > { %1688 = vrcp.f32 %v1013_v15  ;;  %v1215_v62 = vadd.f32 %v1214_v10, %v1108_v35  ;;  %v1119_v55 = vrot.slane %v1108_v35, 4 }
 0x39d   : > { %v1234_v7 = vadd.f32 %v2265_v21, %v1119_v55 }
 0x39e   : > { %v1177_v42 = vpop.f32.mrf.mxu0 }
 0x39f   : > { %v1178_v46 = vadd.f32 %v1177_v42, %v1088_v2  ;;  %v976_v47 = vpop.xlane.xlu1 %975 }
 0x3a0   : > { %v1687_v48 = vpop.eup %1686 }
 0x3a1   : > { %v1275_v9 = vmul.f32 %v1687_v48, %v1160_v45  ;;  %v1276_v61 = vmul.f32 %v1685_v43, %v1178_v46  ;;  %v1689_v58 = vpop.eup %1688 }
 0x3a2   : > { %v1110_v32 = vpop.f32.mrf.mxu1 }
 0x3a3   : > { %1295 = vst [vmem:[#allocation1 + $0x1] ss:$2 sm:$0xff] %v1275_v9  ;;  %v1120_v18 = vrot.slane %v1110_v32, 4 }
 0x3a4   : > { %1297 = vst [vmem:[#allocation1 + $0x10] ss:$2 sm:$0xff] %v1276_v61 }
 0x3a6   : > { %v1179_v52 = vpop.f32.mrf.mxu0 }
 0x3a7   : > { %v1000_v16 = vpop.xlane.xlu1 %999 }
 0x3a8   : > { %v1014_v22 = vadd.f32 %v1000_v16, %v976_v47 }
 0x3aa   : > { %1690 = vrcp.f32 %v1014_v22  ;;  %v1196_v33 = vpop.f32.mrf.mxu1  ;;  %v1300_v5 = vld.sshfl [vmem:[#allocation1] sm:$0xff pattern:$0x75316420] }
 0x3ab   : > { %v1197_v57 = vadd.f32 %v1196_v33, %v1118_v54  ;;  %1692 = vrcp.f32 %v1016_v27 }
 0x3ad   : > { %v1277_v59 = vmul.f32 %v1689_v58, %v1197_v57 }
 0x3ae   : > { %v1251_v60 = vpop.f32.mrf.mxu0 }
 0x3af   : > { %1299 = vst [vmem:[#allocation1 + $0x11] ss:$2 sm:$0xff] %v1277_v59  ;;  %v979_v0 = vpop.xlane.xlu1 %978  ;;  %v1252_v34 = vadd.f32 %v1251_v60, %v1110_v32 }
 0x3b0   : > { %v1691_v50 = vpop.eup %1690  ;;  %v1015_v4 = vadd.f32 %v1003_v30, %v979_v0 }
 0x3b1   : > { %v1278_v3 = vmul.f32 %v1691_v50, %v1215_v62  ;;  %v1693_v6 = vpop.eup %1692 }
 0x3b2   : > { %1694 = vrcp.f32 %v1015_v4  ;;  %v1198_v40 = vpop.f32.mrf.mxu1  ;;  %v1280_v63 = vmul.f32 %v1693_v6, %v1252_v34 }
 0x3b3   : > { %1308 = vst [vmem:[#allocation1] ss:$2 sm:$0xff] %v1278_v3  ;;  %1696 = vrcp.f32 %v516_v25 }
 0x3b6   : > { %v1301_v8 = vld.sshfl [vmem:[#allocation1 + $0x10] sm:$0xff pattern:$0x75316420]  ;;  %v1253_v11 = vpop.f32.mrf.mxu0 }
 0x3b7   : > { %1312 = vst [vmem:[#allocation1 + $0x10] ss:$2 sm:$0xff] %v1280_v63  ;;  %v1009_v13 = vpop.xlane.xlu1 %1008 }
 0x3b8   : > { %v1695_v17 = vpop.eup %1694  ;;  %v1017_v51 = vadd.f32 %v1009_v13, %v985_v39 }
 0x3b9   : > { %v1279_v19 = vmul.f32 %v1695_v17, %v1234_v7  ;;  %v1697_v12 = vpop.eup %1696 }
 0x3ba   : > { %1698 = vrcp.f32 %v1017_v51  ;;  %v1270_v20 = vpop.f32.mrf.mxu1  ;;  %v561_v23 = vmul.f32 %v1697_v12, %v2080_v1 }
 0x3bb   : > { %1310 = vst [vmem:[#allocation1 + $0x1] ss:$2 sm:$0xff] %v1279_v19  ;;  %v1271_v44 = vadd.f32 %v1270_v20, %v1120_v18  ;;  %1700 = vrcp.f32 %v513_v14 }
 0x3c0   : > { %v1699_v38 = vpop.eup %1698 }
 0x3c1   : > { %v1281_v41 = vmul.f32 %v1699_v38, %v1271_v44  ;;  %v1701_v2 = vpop.eup %1700 }
 0x3c2   : > { %v1272_v10 = vpop.f32.mrf.mxu1  ;;  %v1315_v26 = vld.sshfl [vmem:[#allocation1] sm:$0xff pattern:$0x75316420]  ;;  %v560_v56 = vmul.f32 %v1701_v2, %v2057_v37 }
 0x3c3   : > { %1314 = vst [vmem:[#allocation1 + $0x11] ss:$2 sm:$0xff] %v1281_v41  ;;  %v1641_v21 = vpack.i.bf16 %v1315_v26, %v561_v23 }
 0x3c5   : > { %1642 = vrot.lane.b32.xlu1 %v1641_v21, %s1790_s29 }
 0x3ca   : > { %v1316_v28 = vld.sshfl [vmem:[#allocation1 + $0x10] sm:$0xff pattern:$0x75316420] }
 0x3cb   : > { %1319 = vrot.lane.b32.xlu0 %v1316_v28, %s1790_s29 }
 0x437   : > { %v1643_v29 = vpop.permute.xlu1 %1642 }
 0x438   : > { %v1645_v31 = vunpack.i.h.bf16 %v1643_v29  ;;  %v1644_v24 = vunpack.i.l.bf16 %v1643_v29 }
 0x43a   : > { %v1323_v1 = vsel %vm450_vm0, %v1300_v5, %v1645_v31  ;;  %v1286_v35 = vsel %vm450_vm0, %v560_v56, %v1644_v24 }
 0x43b   : > { %v1325_v36 = vpack.c.bf16 %v1323_v1, %v1323_v1  ;;  %v1287_v39 = vpack.c.bf16 %v1286_v35, %v1286_v35 }
 0x43d   : > { %1288 = vst [vmem:[%s389_s12] sm:$0xf] %v1287_v39  ;;  %v1320_v42 = vpop.permute.xlu0 %1319  ;;  %1335 = sbr.rel (!%p1924_p13) target bundleno = 1098 (0x44a), region = 159 }
 0x43e   : > { %1327 = vst [vmem:[%s389_s12 + $0x4] sm:$0xf] %v1325_v36  ;;  %v1324_v43 = vsel %vm450_vm0, %v1301_v8, %v1320_v42 }
 0x43f   : > { %v1326_v45 = vpack.c.bf16 %v1324_v43, %v1324_v43 }
 0x441   : > { %1328 = vst [vmem:[%s389_s12 + $0x8] sm:$0xf] %v1326_v45 }
 0x444   : > { %v1356_v37 = vld [vmem:[%s389_s12] sm:$0xf] }
 0x445   : > { %v1358_v46 = vld [vmem:[%s389_s12 + $0x4] sm:$0xf]  ;;  %1357 = vst [vmem:[%s1339_s5] sm:$0xf] %v1356_v37 }
 0x446   : > { %1359 = vst [vmem:[%s1339_s5 + $0x8] sm:$0xf] %v1358_v46 }
 0x448   : > { %v1360_v47 = vld [vmem:[%s389_s12 + $0x8] sm:$0xf] }
 0x449   : > { %1361 = vst [vmem:[%s1339_s5 + $0x10] sm:$0xf] %v1360_v47 }
 0x44a PF: > { %s13_s22 = sadd.s32 1, %s1788_s22   ;;  %s2331_s7 = sld [smem:[#allocation6_spill]] }
 0x44b   : > { %p10_p4 = scmp.ge.s32.totalorder %s13_s22, 6   ;;  %s2332_s12 = smov %s1752_s13 }
 0x44c   : > { %s2333_s13 = smov %s1929_s26  ;;  %s2334_s14 = smov %s1760_s15 }
 0x44d   : > { %s2335_s15 = smov %s1907_s28  ;;  %s2336_s16 = smov %s1768_s17 }
 0x44e   : > { %s2337_s17 = smov %s1904_s11  ;;  %s2338_s18 = smov %s1780_s20 }
 0x44f   : > { %s2339_s19 = smov %s1784_s21  ;;  %s2340_s20 = smov %s2343_s24 }
 0x450   : > { %s2341_s21 = smov %s2331_s7  ;;  %12 = sbr.rel (!%p10_p4) target bundleno = 8 (0x8), region = 260 }

</bundles_post_ra>
